<compile_context>
chip_gen: v7x
topology: tpu7x:2x2x1
jax: 0.10.0
libtpu: 0.0.40
codegen_flags: <defaults>
</compile_context>

<pallas_src>
import numpy as np
import jax
import jax.numpy as jnp
from jax.experimental import pallas as pl
from jax.experimental.pallas import tpu as pltpu

# ----------------------------- model constants ------------------------------
LANE = 128          # TPU lane width
KSZ = 5             # conv kernel size
C1 = 6              # conv1 output channels
C2 = 16             # conv2 output channels
HID = 20            # fc1 hidden nodes
IN_HW = 24          # implied by the module: conv1_out_dim = 24 - k + 1
CONV1_HW = IN_HW - KSZ + 1        # 20
POOL1_HW = CONV1_HW // 2          # 10
CONV2_HW = POOL1_HW - KSZ + 1     # 6
POOL2_HW = CONV2_HW // 2          # 3
FLAT = C2 * POOL2_HW * POOL2_HW   # 144


# ------------------------------ in-kernel helpers ---------------------------

def _shift_lanes_left(v, k):
    """result[:, i] = v[:, i + k] for i < LANE - k (wrap lands only in unused lanes)."""
    return jnp.concatenate([v[:, k:], v[:, :k]], axis=-1)


def _row(v, i):
    return v[i:i + 1, :]          # static sublane slice -> [1, LANE]


def _sigmoid_f32(z, approx):
    # f32 exp (EUP) + reciprocal (EUP); no VALU divide.
    return pl.reciprocal(1.0 + jnp.exp(-z), approx=approx)


# --------------------------------- kernel -----------------------------------

def _fused_blink_kernel(x_ref, t1_ref, t2_ref, wf1_ref, wf3_ref, b_ref, o_ref):
    # x_ref   : [B, 24, 24]  f32    input image (W on lanes)
    # t1_ref  : [5, 24, 128] bf16   conv1 banded weights; col = 6*w_out + c_out
    # t2_ref  : [5, 128, 128] bf16  conv2 banded weights; row = 12*w_pool + c_in,
    #                               col = 16*w_out + c_out
    # wf1_ref : [384, 128]   bf16   fc1; row = 128*h + 32*w + c2, col = hidden
    # wf3_ref : [128, 128]   bf16   fc3; col 0 is the real output unit
    # b_ref   : [4, 128]     f32    packed bias rows: conv1, conv2, fc1, fc3
    # o_ref   : [B, 128]     f32    lane-dense output; column 0 is the real logit
    B = x_ref.shape[0]
    f32 = jnp.float32
    bias1 = b_ref[0:1, :]
    bias2 = b_ref[1:2, :]
    biasf1 = b_ref[2:3, :]
    biasf3 = b_ref[3:4, :]

    # -------- conv1 (MXU banded matmul) + pool1, per batch row ----------------
    p1_list = []
    for b in range(B):
        xb = x_ref[b].astype(jnp.bfloat16)                     # [24, 24]
        acc1 = None
        for ki in range(KSZ):
            m = jnp.dot(xb, t1_ref[ki], preferred_element_type=f32)   # [24, 128]
            term = m[ki:ki + CONV1_HW, :]                      # rows h_out + ki
            acc1 = term if acc1 is None else acc1 + term
        h1 = acc1 + bias1                                      # [20,128]; lane 6*w+c
        # 2x2 max pool: width pairs are 6 lanes apart, height pairs are row pairs.
        pw = jnp.maximum(h1, _shift_lanes_left(h1, C1))        # valid lane 12*wp + c
        rows = [jnp.maximum(_row(pw, 2 * i), _row(pw, 2 * i + 1))
                for i in range(POOL1_HW)]
        p1_list.append(jnp.concatenate(rows, axis=0))          # [10, 128]

    # -------- conv2 (MXU banded matmul), batch rows stacked in one LHS --------
    p1 = jnp.concatenate(p1_list, axis=0).astype(jnp.bfloat16)     # [B*10, 128]
    m2 = [jnp.dot(p1, t2_ref[ki], preferred_element_type=f32)      # [B*10, 128]
          for ki in range(KSZ)]

    feats = []
    for b in range(B):
        acc2 = None
        for ki in range(KSZ):
            term = m2[ki][b * POOL1_HW + ki: b * POOL1_HW + ki + CONV2_HW, :]
            acc2 = term if acc2 is None else acc2 + term
        h2 = acc2 + bias2                                      # [6,128]; lane 16*w2+c2
        pw2 = jnp.maximum(h2, _shift_lanes_left(h2, C2))       # valid lane 32*wp2+c2
        prow = [jnp.maximum(_row(pw2, 2 * i), _row(pw2, 2 * i + 1))
                for i in range(POOL2_HW)]                      # 3 x [1, 128]
        feats.append(jnp.concatenate(prow, axis=-1))           # [1, 384] (lane-aligned)
    flat = jnp.concatenate(feats, axis=0).astype(jnp.bfloat16)     # [B, 384]

    # -------- fc1 + sigmoid (single MXU matmul, K = 3*128) --------------------
    a1 = jnp.dot(flat, wf1_ref[...], preferred_element_type=f32) + biasf1
    a1 = _sigmoid_f32(a1, approx=True)                         # [B, 128]

    # -------- fc3 + sigmoid ----------------------------------------------------
    y = jnp.dot(a1.astype(jnp.bfloat16), wf3_ref[...],
                preferred_element_type=f32) + biasf3
    o_ref[...] = _sigmoid_f32(y, approx=False)                 # exact recip for output


# ------------------------------ wrapper / glue -------------------------------

def _full(shape):
    # Whole-array block (block_shape == full array dims satisfies the (8,128) rule).
    return pl.BlockSpec(shape, lambda i, _s=shape: (0,) * len(_s))


@jax.jit
def blink_forward(x, pp):
    """x: [B, 1, 24, 24] (torch NCHW). Returns [B, 1] sigmoid outputs."""
    B = x.shape[0]
    xs = x.reshape(B, IN_HW, IN_HW)            # drop singleton channel (free reshape)
    out = pl.pallas_call(
        _fused_blink_kernel,
        out_shape=jax.ShapeDtypeStruct((B, LANE), jnp.float32),
        grid=(1,),
        in_specs=[
            _full(xs.shape),
            _full(pp["t1"].shape),
            _full(pp["t2"].shape),
            _full(pp["wf1"].shape),
            _full(pp["wf3"].shape),
            _full(pp["b"].shape),
        ],
        out_specs=_full((B, LANE)),
        compiler_params=pltpu.CompilerParams(
            dimension_semantics=("arbitrary",),
            vmem_limit_bytes=32 * 1024 * 1024,
        ),
    )(xs, pp["t1"], pp["t2"], pp["wf1"], pp["wf3"], pp["b"])
    return out[:, :1]                          # lane-dense -> real logit


def prepare_params(p):
    """Build banded (Toeplitz) MXU weight tables from torch-layout params (once)."""
    w1 = np.asarray(p["w1"]); b1 = np.asarray(p["b1"])
    w2 = np.asarray(p["w2"]); b2 = np.asarray(p["b2"])
    wf1 = np.asarray(p["wf1"]); bf1 = np.asarray(p["bf1"])
    wf3 = np.asarray(p["wf3"]); bf3 = np.asarray(p["bf3"])

    # conv1: t1[ki, w_in, 6*w_out + c] = W1[c, 0, ki, w_in - w_out]
    t1 = np.zeros((KSZ, IN_HW, LANE), np.float32)
    bias1 = np.zeros((LANE,), np.float32)
    for w in range(CONV1_HW):
        bias1[C1 * w: C1 * w + C1] = b1
        for ki in range(KSZ):
            for kj in range(KSZ):
                t1[ki, w + kj, C1 * w: C1 * w + C1] = w1[:, 0, ki, kj]

    # conv2: t2[ki, 12*w_pool + c_in, 16*w_out + c_out] = W2[c_out, c_in, ki, w_pool - w_out]
    t2 = np.zeros((KSZ, LANE, LANE), np.float32)
    bias2 = np.zeros((LANE,), np.float32)
    for w2o in range(CONV2_HW):
        bias2[C2 * w2o: C2 * w2o + C2] = b2
        for ki in range(KSZ):
            for kj in range(KSZ):
                wp = w2o + kj
                for ci in range(C1):
                    t2[ki, 2 * C1 * wp + ci, C2 * w2o: C2 * w2o + C2] = w2[:, ci, ki, kj]

    # fc1: kernel feature lane = 128*h + 32*w + c2 ; torch flat index = c2*9 + h*3 + w
    wf1p = np.zeros((POOL2_HW * LANE, LANE), np.float32)
    for hp in range(POOL2_HW):
        for wp in range(POOL2_HW):
            for c in range(C2):
                row = LANE * hp + 2 * C2 * wp + c
                flat = c * POOL2_HW * POOL2_HW + hp * POOL2_HW + wp
                wf1p[row, :HID] = wf1[:, flat]
    biasf1 = np.zeros((LANE,), np.float32)
    biasf1[:HID] = bf1

    # fc3: column 0 holds the single output unit
    wf3p = np.zeros((LANE, LANE), np.float32)
    wf3p[:HID, 0] = wf3[0]
    biasf3 = np.zeros((LANE,), np.float32)
    biasf3[0] = bf3[0]

    bias_tab = np.stack([bias1, bias2, biasf1, biasf3], axis=0)   # [4, 128]

    return {
        "t1": jnp.asarray(t1, jnp.bfloat16),
        "t2": jnp.asarray(t2, jnp.bfloat16),
        "wf1": jnp.asarray(wf1p, jnp.bfloat16),
        "wf3": jnp.asarray(wf3p, jnp.bfloat16),
        "b": jnp.asarray(bias_tab, jnp.float32),
    }


# ------------------------- parameter init (torch layouts) --------------------

def init_params(key):
    ks = jax.random.split(key, 8)

    def u(k, shape, fan_in):
        bound = 1.0 / (fan_in ** 0.5)
        return jax.random.uniform(k, shape, jnp.float32, -bound, bound)

    return {
        "w1": u(ks[0], (C1, 1, KSZ, KSZ), KSZ * KSZ),
        "b1": u(ks[1], (C1,), KSZ * KSZ),
        "w2": u(ks[2], (C2, C1, KSZ, KSZ), C1 * KSZ * KSZ),
        "b2": u(ks[3], (C2,), C1 * KSZ * KSZ),
        "wf1": u(ks[4], (HID, FLAT), FLAT),
        "bf1": u(ks[5], (HID,), FLAT),
        "wf3": u(ks[6], (1, HID), HID),
        "bf3": u(ks[7], (1,), HID),
    }


# ----------------------------- pure-JAX reference ----------------------------

def _ref_pool(x):
    b, c, h, w = x.shape
    return x.reshape(b, c, h // 2, 2, w // 2, 2).max(axis=(3, 5))


def reference_forward(x, p):
    dn = ("NCHW", "OIHW", "NCHW")
    out = jax.lax.conv_general_dilated(x, p["w1"], (1, 1), "VALID",
                                       dimension_numbers=dn)
    out = _ref_pool(out + p["b1"][None, :, None, None])
    out = jax.lax.conv_general_dilated(out, p["w2"], (1, 1), "VALID",
                                       dimension_numbers=dn)
    out = _ref_pool(out + p["b2"][None, :, None, None])
    f = out.reshape(out.shape[0], -1)
    h = jax.nn.sigmoid(f @ p["wf1"].T + p["bf1"])
    return jax.nn.sigmoid(h @ p["wf3"].T + p["bf3"])


# ----------------------------------- main ------------------------------------

if __name__ == "__main__":
    key = jax.random.PRNGKey(0)
    pkey, xkey = jax.random.split(key)
    params = init_params(pkey)
    padded = prepare_params(params)

    # Module implies 24x24 single-channel input (conv1_out_dim = 24 - k + 1).
    B = 2
    x = jax.random.normal(xkey, (B, 1, IN_HW, IN_HW), dtype=jnp.float32)

    out = jax.block_until_ready(blink_forward(x, padded))
    ref = jax.block_until_ready(reference_forward(x, params))

    assert out.shape == (B, 1), out.shape
    assert bool(jnp.all(jnp.isfinite(out)))
    assert bool(jnp.all((out >= 0.0) & (out <= 1.0)))
    assert bool(jnp.allclose(out, ref, atol=2e-2, rtol=2e-2)), (out, ref)
    print("KERNEL_OK")
</pallas_src>

<mosaic_0001>
module attributes {stable_mosaic.version = 11 : i64} {
  func.func @_fused_blink_kernel(%arg0: i32, %arg1: memref<2x24x24xf32, #tpu.memory_space<vmem>>, %arg2: memref<5x24x128xbf16, #tpu.memory_space<vmem>>, %arg3: memref<5x128x128xbf16, #tpu.memory_space<vmem>>, %arg4: memref<384x128xbf16, #tpu.memory_space<vmem>>, %arg5: memref<128x128xbf16, #tpu.memory_space<vmem>>, %arg6: memref<4x128xf32, #tpu.memory_space<vmem>>, %arg7: memref<2x128xf32, #tpu.memory_space<vmem>>) attributes {dimension_semantics = [#tpu.dimension_semantics<arbitrary>], iteration_bounds = array<i64: 1>, scalar_prefetch = 0 : i64, scratch_operands = 0 : i64, tpu.core_type = #tpu.core_type<tc>, window_params = [{pipeline_mode = #tpu.pipeline_mode<synchronous>, transform_indices = @transform_0, window_bounds = array<i64: 2, 24, 24>}, {pipeline_mode = #tpu.pipeline_mode<synchronous>, transform_indices = @transform_1, window_bounds = array<i64: 5, 24, 128>}, {pipeline_mode = #tpu.pipeline_mode<synchronous>, transform_indices = @transform_2, window_bounds = array<i64: 5, 128, 128>}, {pipeline_mode = #tpu.pipeline_mode<synchronous>, transform_indices = @transform_3, window_bounds = array<i64: 384, 128>}, {pipeline_mode = #tpu.pipeline_mode<synchronous>, transform_indices = @transform_4, window_bounds = array<i64: 128, 128>}, {pipeline_mode = #tpu.pipeline_mode<synchronous>, transform_indices = @transform_5, window_bounds = array<i64: 4, 128>}, {pipeline_mode = #tpu.pipeline_mode<synchronous>, transform_indices = @transform_6, window_bounds = array<i64: 2, 128>}]} {
    %c0 = arith.constant 0 : index
    %c0_0 = arith.constant 0 : index
    %0 = vector.load %arg6[%c0, %c0_0] : memref<4x128xf32, #tpu.memory_space<vmem>>, vector<1x128xf32>
    %c1 = arith.constant 1 : index
    %c0_1 = arith.constant 0 : index
    %1 = vector.load %arg6[%c1, %c0_1] : memref<4x128xf32, #tpu.memory_space<vmem>>, vector<1x128xf32>
    %c2 = arith.constant 2 : index
    %c0_2 = arith.constant 0 : index
    %2 = vector.load %arg6[%c2, %c0_2] : memref<4x128xf32, #tpu.memory_space<vmem>>, vector<1x128xf32>
    %c3 = arith.constant 3 : index
    %c0_3 = arith.constant 0 : index
    %3 = vector.load %arg6[%c3, %c0_3] : memref<4x128xf32, #tpu.memory_space<vmem>>, vector<1x128xf32>
    %c0_4 = arith.constant 0 : index
    %c0_5 = arith.constant 0 : index
    %c0_6 = arith.constant 0 : index
    %4 = vector.load %arg1[%c0_4, %c0_5, %c0_6] : memref<2x24x24xf32, #tpu.memory_space<vmem>>, vector<1x24x24xf32>
    %5 = vector.shape_cast %4 : vector<1x24x24xf32> to vector<24x24xf32>
    %6 = arith.truncf %5 : vector<24x24xf32> to vector<24x24xbf16>
    %c0_7 = arith.constant 0 : index
    %c0_8 = arith.constant 0 : index
    %c0_9 = arith.constant 0 : index
    %7 = vector.load %arg2[%c0_7, %c0_8, %c0_9] : memref<5x24x128xbf16, #tpu.memory_space<vmem>>, vector<1x24x128xbf16>
    %8 = vector.shape_cast %7 : vector<1x24x128xbf16> to vector<24x128xbf16>
    %cst = arith.constant dense<0.000000e+00> : vector<24x128xf32>
    %9 = tpu.matmul %6, %8, %cst {dimension_numbers = #tpu.dot_dimension_numbers<[1], [0], [0], [1], [0, 0, 1, 1], [], []>} : vector<24x24xbf16>, vector<24x128xbf16>, vector<24x128xf32> -> vector<24x128xf32>
    %10 = vector.extract_strided_slice %9 {offsets = [0, 0], sizes = [20, 128], strides = [1, 1]} : vector<24x128xf32> to vector<20x128xf32>
    %c1_10 = arith.constant 1 : index
    %c0_11 = arith.constant 0 : index
    %c0_12 = arith.constant 0 : index
    %11 = vector.load %arg2[%c1_10, %c0_11, %c0_12] : memref<5x24x128xbf16, #tpu.memory_space<vmem>>, vector<1x24x128xbf16>
    %12 = vector.shape_cast %11 : vector<1x24x128xbf16> to vector<24x128xbf16>
    %cst_13 = arith.constant dense<0.000000e+00> : vector<24x128xf32>
    %13 = tpu.matmul %6, %12, %cst_13 {dimension_numbers = #tpu.dot_dimension_numbers<[1], [0], [0], [1], [0, 0, 1, 1], [], []>} : vector<24x24xbf16>, vector<24x128xbf16>, vector<24x128xf32> -> vector<24x128xf32>
    %14 = vector.extract_strided_slice %13 {offsets = [1, 0], sizes = [20, 128], strides = [1, 1]} : vector<24x128xf32> to vector<20x128xf32>
    %15 = arith.addf %10, %14 : vector<20x128xf32>
    %c2_14 = arith.constant 2 : index
    %c0_15 = arith.constant 0 : index
    %c0_16 = arith.constant 0 : index
    %16 = vector.load %arg2[%c2_14, %c0_15, %c0_16] : memref<5x24x128xbf16, #tpu.memory_space<vmem>>, vector<1x24x128xbf16>
    %17 = vector.shape_cast %16 : vector<1x24x128xbf16> to vector<24x128xbf16>
    %cst_17 = arith.constant dense<0.000000e+00> : vector<24x128xf32>
    %18 = tpu.matmul %6, %17, %cst_17 {dimension_numbers = #tpu.dot_dimension_numbers<[1], [0], [0], [1], [0, 0, 1, 1], [], []>} : vector<24x24xbf16>, vector<24x128xbf16>, vector<24x128xf32> -> vector<24x128xf32>
    %19 = vector.extract_strided_slice %18 {offsets = [2, 0], sizes = [20, 128], strides = [1, 1]} : vector<24x128xf32> to vector<20x128xf32>
    %20 = arith.addf %15, %19 : vector<20x128xf32>
    %c3_18 = arith.constant 3 : index
    %c0_19 = arith.constant 0 : index
    %c0_20 = arith.constant 0 : index
    %21 = vector.load %arg2[%c3_18, %c0_19, %c0_20] : memref<5x24x128xbf16, #tpu.memory_space<vmem>>, vector<1x24x128xbf16>
    %22 = vector.shape_cast %21 : vector<1x24x128xbf16> to vector<24x128xbf16>
    %cst_21 = arith.constant dense<0.000000e+00> : vector<24x128xf32>
    %23 = tpu.matmul %6, %22, %cst_21 {dimension_numbers = #tpu.dot_dimension_numbers<[1], [0], [0], [1], [0, 0, 1, 1], [], []>} : vector<24x24xbf16>, vector<24x128xbf16>, vector<24x128xf32> -> vector<24x128xf32>
    %24 = vector.extract_strided_slice %23 {offsets = [3, 0], sizes = [20, 128], strides = [1, 1]} : vector<24x128xf32> to vector<20x128xf32>
    %25 = arith.addf %20, %24 : vector<20x128xf32>
    %c4 = arith.constant 4 : index
    %c0_22 = arith.constant 0 : index
    %c0_23 = arith.constant 0 : index
    %26 = vector.load %arg2[%c4, %c0_22, %c0_23] : memref<5x24x128xbf16, #tpu.memory_space<vmem>>, vector<1x24x128xbf16>
    %27 = vector.shape_cast %26 : vector<1x24x128xbf16> to vector<24x128xbf16>
    %cst_24 = arith.constant dense<0.000000e+00> : vector<24x128xf32>
    %28 = tpu.matmul %6, %27, %cst_24 {dimension_numbers = #tpu.dot_dimension_numbers<[1], [0], [0], [1], [0, 0, 1, 1], [], []>} : vector<24x24xbf16>, vector<24x128xbf16>, vector<24x128xf32> -> vector<24x128xf32>
    %29 = vector.extract_strided_slice %28 {offsets = [4, 0], sizes = [20, 128], strides = [1, 1]} : vector<24x128xf32> to vector<20x128xf32>
    %30 = arith.addf %25, %29 : vector<20x128xf32>
    %31 = vector.broadcast %0 : vector<1x128xf32> to vector<20x128xf32>
    %32 = arith.addf %30, %31 : vector<20x128xf32>
    %33 = vector.extract_strided_slice %32 {offsets = [0, 6], sizes = [20, 122], strides = [1, 1]} : vector<20x128xf32> to vector<20x122xf32>
    %34 = vector.extract_strided_slice %32 {offsets = [0, 0], sizes = [20, 6], strides = [1, 1]} : vector<20x128xf32> to vector<20x6xf32>
    %35 = tpu.concatenate %33, %34 in 1 : vector<20x122xf32>, vector<20x6xf32> -> vector<20x128xf32>
    %36 = arith.maximumf %32, %35 : vector<20x128xf32>
    %37 = vector.extract_strided_slice %36 {offsets = [0, 0], sizes = [1, 128], strides = [1, 1]} : vector<20x128xf32> to vector<1x128xf32>
    %38 = vector.extract_strided_slice %36 {offsets = [1, 0], sizes = [1, 128], strides = [1, 1]} : vector<20x128xf32> to vector<1x128xf32>
    %39 = arith.maximumf %37, %38 : vector<1x128xf32>
    %40 = vector.extract_strided_slice %36 {offsets = [2, 0], sizes = [1, 128], strides = [1, 1]} : vector<20x128xf32> to vector<1x128xf32>
    %41 = vector.extract_strided_slice %36 {offsets = [3, 0], sizes = [1, 128], strides = [1, 1]} : vector<20x128xf32> to vector<1x128xf32>
    %42 = arith.maximumf %40, %41 : vector<1x128xf32>
    %43 = vector.extract_strided_slice %36 {offsets = [4, 0], sizes = [1, 128], strides = [1, 1]} : vector<20x128xf32> to vector<1x128xf32>
    %44 = vector.extract_strided_slice %36 {offsets = [5, 0], sizes = [1, 128], strides = [1, 1]} : vector<20x128xf32> to vector<1x128xf32>
    %45 = arith.maximumf %43, %44 : vector<1x128xf32>
    %46 = vector.extract_strided_slice %36 {offsets = [6, 0], sizes = [1, 128], strides = [1, 1]} : vector<20x128xf32> to vector<1x128xf32>
    %47 = vector.extract_strided_slice %36 {offsets = [7, 0], sizes = [1, 128], strides = [1, 1]} : vector<20x128xf32> to vector<1x128xf32>
    %48 = arith.maximumf %46, %47 : vector<1x128xf32>
    %49 = vector.extract_strided_slice %36 {offsets = [8, 0], sizes = [1, 128], strides = [1, 1]} : vector<20x128xf32> to vector<1x128xf32>
    %50 = vector.extract_strided_slice %36 {offsets = [9, 0], sizes = [1, 128], strides = [1, 1]} : vector<20x128xf32> to vector<1x128xf32>
    %51 = arith.maximumf %49, %50 : vector<1x128xf32>
    %52 = vector.extract_strided_slice %36 {offsets = [10, 0], sizes = [1, 128], strides = [1, 1]} : vector<20x128xf32> to vector<1x128xf32>
    %53 = vector.extract_strided_slice %36 {offsets = [11, 0], sizes = [1, 128], strides = [1, 1]} : vector<20x128xf32> to vector<1x128xf32>
    %54 = arith.maximumf %52, %53 : vector<1x128xf32>
    %55 = vector.extract_strided_slice %36 {offsets = [12, 0], sizes = [1, 128], strides = [1, 1]} : vector<20x128xf32> to vector<1x128xf32>
    %56 = vector.extract_strided_slice %36 {offsets = [13, 0], sizes = [1, 128], strides = [1, 1]} : vector<20x128xf32> to vector<1x128xf32>
    %57 = arith.maximumf %55, %56 : vector<1x128xf32>
    %58 = vector.extract_strided_slice %36 {offsets = [14, 0], sizes = [1, 128], strides = [1, 1]} : vector<20x128xf32> to vector<1x128xf32>
    %59 = vector.extract_strided_slice %36 {offsets = [15, 0], sizes = [1, 128], strides = [1, 1]} : vector<20x128xf32> to vector<1x128xf32>
    %60 = arith.maximumf %58, %59 : vector<1x128xf32>
    %61 = vector.extract_strided_slice %36 {offsets = [16, 0], sizes = [1, 128], strides = [1, 1]} : vector<20x128xf32> to vector<1x128xf32>
    %62 = vector.extract_strided_slice %36 {offsets = [17, 0], sizes = [1, 128], strides = [1, 1]} : vector<20x128xf32> to vector<1x128xf32>
    %63 = arith.maximumf %61, %62 : vector<1x128xf32>
    %64 = vector.extract_strided_slice %36 {offsets = [18, 0], sizes = [1, 128], strides = [1, 1]} : vector<20x128xf32> to vector<1x128xf32>
    %65 = vector.extract_strided_slice %36 {offsets = [19, 0], sizes = [1, 128], strides = [1, 1]} : vector<20x128xf32> to vector<1x128xf32>
    %66 = arith.maximumf %64, %65 : vector<1x128xf32>
    %67 = tpu.concatenate %39, %42, %45, %48, %51, %54, %57, %60, %63, %66 in 0 : vector<1x128xf32>, vector<1x128xf32>, vector<1x128xf32>, vector<1x128xf32>, vector<1x128xf32>, vector<1x128xf32>, vector<1x128xf32>, vector<1x128xf32>, vector<1x128xf32>, vector<1x128xf32> -> vector<10x128xf32>
    %c1_25 = arith.constant 1 : index
    %c0_26 = arith.constant 0 : index
    %c0_27 = arith.constant 0 : index
    %68 = vector.load %arg1[%c1_25, %c0_26, %c0_27] : memref<2x24x24xf32, #tpu.memory_space<vmem>>, vector<1x24x24xf32>
    %69 = vector.shape_cast %68 : vector<1x24x24xf32> to vector<24x24xf32>
    %70 = arith.truncf %69 : vector<24x24xf32> to vector<24x24xbf16>
    %c0_28 = arith.constant 0 : index
    %c0_29 = arith.constant 0 : index
    %c0_30 = arith.constant 0 : index
    %71 = vector.load %arg2[%c0_28, %c0_29, %c0_30] : memref<5x24x128xbf16, #tpu.memory_space<vmem>>, vector<1x24x128xbf16>
    %72 = vector.shape_cast %71 : vector<1x24x128xbf16> to vector<24x128xbf16>
    %cst_31 = arith.constant dense<0.000000e+00> : vector<24x128xf32>
    %73 = tpu.matmul %70, %72, %cst_31 {dimension_numbers = #tpu.dot_dimension_numbers<[1], [0], [0], [1], [0, 0, 1, 1], [], []>} : vector<24x24xbf16>, vector<24x128xbf16>, vector<24x128xf32> -> vector<24x128xf32>
    %74 = vector.extract_strided_slice %73 {offsets = [0, 0], sizes = [20, 128], strides = [1, 1]} : vector<24x128xf32> to vector<20x128xf32>
    %c1_32 = arith.constant 1 : index
    %c0_33 = arith.constant 0 : index
    %c0_34 = arith.constant 0 : index
    %75 = vector.load %arg2[%c1_32, %c0_33, %c0_34] : memref<5x24x128xbf16, #tpu.memory_space<vmem>>, vector<1x24x128xbf16>
    %76 = vector.shape_cast %75 : vector<1x24x128xbf16> to vector<24x128xbf16>
    %cst_35 = arith.constant dense<0.000000e+00> : vector<24x128xf32>
    %77 = tpu.matmul %70, %76, %cst_35 {dimension_numbers = #tpu.dot_dimension_numbers<[1], [0], [0], [1], [0, 0, 1, 1], [], []>} : vector<24x24xbf16>, vector<24x128xbf16>, vector<24x128xf32> -> vector<24x128xf32>
    %78 = vector.extract_strided_slice %77 {offsets = [1, 0], sizes = [20, 128], strides = [1, 1]} : vector<24x128xf32> to vector<20x128xf32>
    %79 = arith.addf %74, %78 : vector<20x128xf32>
    %c2_36 = arith.constant 2 : index
    %c0_37 = arith.constant 0 : index
    %c0_38 = arith.constant 0 : index
    %80 = vector.load %arg2[%c2_36, %c0_37, %c0_38] : memref<5x24x128xbf16, #tpu.memory_space<vmem>>, vector<1x24x128xbf16>
    %81 = vector.shape_cast %80 : vector<1x24x128xbf16> to vector<24x128xbf16>
    %cst_39 = arith.constant dense<0.000000e+00> : vector<24x128xf32>
    %82 = tpu.matmul %70, %81, %cst_39 {dimension_numbers = #tpu.dot_dimension_numbers<[1], [0], [0], [1], [0, 0, 1, 1], [], []>} : vector<24x24xbf16>, vector<24x128xbf16>, vector<24x128xf32> -> vector<24x128xf32>
    %83 = vector.extract_strided_slice %82 {offsets = [2, 0], sizes = [20, 128], strides = [1, 1]} : vector<24x128xf32> to vector<20x128xf32>
    %84 = arith.addf %79, %83 : vector<20x128xf32>
    %c3_40 = arith.constant 3 : index
    %c0_41 = arith.constant 0 : index
    %c0_42 = arith.constant 0 : index
    %85 = vector.load %arg2[%c3_40, %c0_41, %c0_42] : memref<5x24x128xbf16, #tpu.memory_space<vmem>>, vector<1x24x128xbf16>
    %86 = vector.shape_cast %85 : vector<1x24x128xbf16> to vector<24x128xbf16>
    %cst_43 = arith.constant dense<0.000000e+00> : vector<24x128xf32>
    %87 = tpu.matmul %70, %86, %cst_43 {dimension_numbers = #tpu.dot_dimension_numbers<[1], [0], [0], [1], [0, 0, 1, 1], [], []>} : vector<24x24xbf16>, vector<24x128xbf16>, vector<24x128xf32> -> vector<24x128xf32>
    %88 = vector.extract_strided_slice %87 {offsets = [3, 0], sizes = [20, 128], strides = [1, 1]} : vector<24x128xf32> to vector<20x128xf32>
    %89 = arith.addf %84, %88 : vector<20x128xf32>
    %c4_44 = arith.constant 4 : index
    %c0_45 = arith.constant 0 : index
    %c0_46 = arith.constant 0 : index
    %90 = vector.load %arg2[%c4_44, %c0_45, %c0_46] : memref<5x24x128xbf16, #tpu.memory_space<vmem>>, vector<1x24x128xbf16>
    %91 = vector.shape_cast %90 : vector<1x24x128xbf16> to vector<24x128xbf16>
    %cst_47 = arith.constant dense<0.000000e+00> : vector<24x128xf32>
    %92 = tpu.matmul %70, %91, %cst_47 {dimension_numbers = #tpu.dot_dimension_numbers<[1], [0], [0], [1], [0, 0, 1, 1], [], []>} : vector<24x24xbf16>, vector<24x128xbf16>, vector<24x128xf32> -> vector<24x128xf32>
    %93 = vector.extract_strided_slice %92 {offsets = [4, 0], sizes = [20, 128], strides = [1, 1]} : vector<24x128xf32> to vector<20x128xf32>
    %94 = arith.addf %89, %93 : vector<20x128xf32>
    %95 = vector.broadcast %0 : vector<1x128xf32> to vector<20x128xf32>
    %96 = arith.addf %94, %95 : vector<20x128xf32>
    %97 = vector.extract_strided_slice %96 {offsets = [0, 6], sizes = [20, 122], strides = [1, 1]} : vector<20x128xf32> to vector<20x122xf32>
    %98 = vector.extract_strided_slice %96 {offsets = [0, 0], sizes = [20, 6], strides = [1, 1]} : vector<20x128xf32> to vector<20x6xf32>
    %99 = tpu.concatenate %97, %98 in 1 : vector<20x122xf32>, vector<20x6xf32> -> vector<20x128xf32>
    %100 = arith.maximumf %96, %99 : vector<20x128xf32>
    %101 = vector.extract_strided_slice %100 {offsets = [0, 0], sizes = [1, 128], strides = [1, 1]} : vector<20x128xf32> to vector<1x128xf32>
    %102 = vector.extract_strided_slice %100 {offsets = [1, 0], sizes = [1, 128], strides = [1, 1]} : vector<20x128xf32> to vector<1x128xf32>
    %103 = arith.maximumf %101, %102 : vector<1x128xf32>
    %104 = vector.extract_strided_slice %100 {offsets = [2, 0], sizes = [1, 128], strides = [1, 1]} : vector<20x128xf32> to vector<1x128xf32>
    %105 = vector.extract_strided_slice %100 {offsets = [3, 0], sizes = [1, 128], strides = [1, 1]} : vector<20x128xf32> to vector<1x128xf32>
    %106 = arith.maximumf %104, %105 : vector<1x128xf32>
    %107 = vector.extract_strided_slice %100 {offsets = [4, 0], sizes = [1, 128], strides = [1, 1]} : vector<20x128xf32> to vector<1x128xf32>
    %108 = vector.extract_strided_slice %100 {offsets = [5, 0], sizes = [1, 128], strides = [1, 1]} : vector<20x128xf32> to vector<1x128xf32>
    %109 = arith.maximumf %107, %108 : vector<1x128xf32>
    %110 = vector.extract_strided_slice %100 {offsets = [6, 0], sizes = [1, 128], strides = [1, 1]} : vector<20x128xf32> to vector<1x128xf32>
    %111 = vector.extract_strided_slice %100 {offsets = [7, 0], sizes = [1, 128], strides = [1, 1]} : vector<20x128xf32> to vector<1x128xf32>
    %112 = arith.maximumf %110, %111 : vector<1x128xf32>
    %113 = vector.extract_strided_slice %100 {offsets = [8, 0], sizes = [1, 128], strides = [1, 1]} : vector<20x128xf32> to vector<1x128xf32>
    %114 = vector.extract_strided_slice %100 {offsets = [9, 0], sizes = [1, 128], strides = [1, 1]} : vector<20x128xf32> to vector<1x128xf32>
    %115 = arith.maximumf %113, %114 : vector<1x128xf32>
    %116 = vector.extract_strided_slice %100 {offsets = [10, 0], sizes = [1, 128], strides = [1, 1]} : vector<20x128xf32> to vector<1x128xf32>
    %117 = vector.extract_strided_slice %100 {offsets = [11, 0], sizes = [1, 128], strides = [1, 1]} : vector<20x128xf32> to vector<1x128xf32>
    %118 = arith.maximumf %116, %117 : vector<1x128xf32>
    %119 = vector.extract_strided_slice %100 {offsets = [12, 0], sizes = [1, 128], strides = [1, 1]} : vector<20x128xf32> to vector<1x128xf32>
    %120 = vector.extract_strided_slice %100 {offsets = [13, 0], sizes = [1, 128], strides = [1, 1]} : vector<20x128xf32> to vector<1x128xf32>
    %121 = arith.maximumf %119, %120 : vector<1x128xf32>
    %122 = vector.extract_strided_slice %100 {offsets = [14, 0], sizes = [1, 128], strides = [1, 1]} : vector<20x128xf32> to vector<1x128xf32>
    %123 = vector.extract_strided_slice %100 {offsets = [15, 0], sizes = [1, 128], strides = [1, 1]} : vector<20x128xf32> to vector<1x128xf32>
    %124 = arith.maximumf %122, %123 : vector<1x128xf32>
    %125 = vector.extract_strided_slice %100 {offsets = [16, 0], sizes = [1, 128], strides = [1, 1]} : vector<20x128xf32> to vector<1x128xf32>
    %126 = vector.extract_strided_slice %100 {offsets = [17, 0], sizes = [1, 128], strides = [1, 1]} : vector<20x128xf32> to vector<1x128xf32>
    %127 = arith.maximumf %125, %126 : vector<1x128xf32>
    %128 = vector.extract_strided_slice %100 {offsets = [18, 0], sizes = [1, 128], strides = [1, 1]} : vector<20x128xf32> to vector<1x128xf32>
    %129 = vector.extract_strided_slice %100 {offsets = [19, 0], sizes = [1, 128], strides = [1, 1]} : vector<20x128xf32> to vector<1x128xf32>
    %130 = arith.maximumf %128, %129 : vector<1x128xf32>
    %131 = tpu.concatenate %103, %106, %109, %112, %115, %118, %121, %124, %127, %130 in 0 : vector<1x128xf32>, vector<1x128xf32>, vector<1x128xf32>, vector<1x128xf32>, vector<1x128xf32>, vector<1x128xf32>, vector<1x128xf32>, vector<1x128xf32>, vector<1x128xf32>, vector<1x128xf32> -> vector<10x128xf32>
    %132 = tpu.concatenate %67, %131 in 0 : vector<10x128xf32>, vector<10x128xf32> -> vector<20x128xf32>
    %133 = arith.truncf %132 : vector<20x128xf32> to vector<20x128xbf16>
    %c0_48 = arith.constant 0 : index
    %c0_49 = arith.constant 0 : index
    %c0_50 = arith.constant 0 : index
    %134 = vector.load %arg3[%c0_48, %c0_49, %c0_50] : memref<5x128x128xbf16, #tpu.memory_space<vmem>>, vector<1x128x128xbf16>
    %135 = vector.shape_cast %134 : vector<1x128x128xbf16> to vector<128x128xbf16>
    %cst_51 = arith.constant dense<0.000000e+00> : vector<20x128xf32>
    %136 = tpu.matmul %133, %135, %cst_51 {dimension_numbers = #tpu.dot_dimension_numbers<[1], [0], [0], [1], [0, 0, 1, 1], [], []>} : vector<20x128xbf16>, vector<128x128xbf16>, vector<20x128xf32> -> vector<20x128xf32>
    %c1_52 = arith.constant 1 : index
    %c0_53 = arith.constant 0 : index
    %c0_54 = arith.constant 0 : index
    %137 = vector.load %arg3[%c1_52, %c0_53, %c0_54] : memref<5x128x128xbf16, #tpu.memory_space<vmem>>, vector<1x128x128xbf16>
    %138 = vector.shape_cast %137 : vector<1x128x128xbf16> to vector<128x128xbf16>
    %cst_55 = arith.constant dense<0.000000e+00> : vector<20x128xf32>
    %139 = tpu.matmul %133, %138, %cst_55 {dimension_numbers = #tpu.dot_dimension_numbers<[1], [0], [0], [1], [0, 0, 1, 1], [], []>} : vector<20x128xbf16>, vector<128x128xbf16>, vector<20x128xf32> -> vector<20x128xf32>
    %c2_56 = arith.constant 2 : index
    %c0_57 = arith.constant 0 : index
    %c0_58 = arith.constant 0 : index
    %140 = vector.load %arg3[%c2_56, %c0_57, %c0_58] : memref<5x128x128xbf16, #tpu.memory_space<vmem>>, vector<1x128x128xbf16>
    %141 = vector.shape_cast %140 : vector<1x128x128xbf16> to vector<128x128xbf16>
    %cst_59 = arith.constant dense<0.000000e+00> : vector<20x128xf32>
    %142 = tpu.matmul %133, %141, %cst_59 {dimension_numbers = #tpu.dot_dimension_numbers<[1], [0], [0], [1], [0, 0, 1, 1], [], []>} : vector<20x128xbf16>, vector<128x128xbf16>, vector<20x128xf32> -> vector<20x128xf32>
    %c3_60 = arith.constant 3 : index
    %c0_61 = arith.constant 0 : index
    %c0_62 = arith.constant 0 : index
    %143 = vector.load %arg3[%c3_60, %c0_61, %c0_62] : memref<5x128x128xbf16, #tpu.memory_space<vmem>>, vector<1x128x128xbf16>
    %144 = vector.shape_cast %143 : vector<1x128x128xbf16> to vector<128x128xbf16>
    %cst_63 = arith.constant dense<0.000000e+00> : vector<20x128xf32>
    %145 = tpu.matmul %133, %144, %cst_63 {dimension_numbers = #tpu.dot_dimension_numbers<[1], [0], [0], [1], [0, 0, 1, 1], [], []>} : vector<20x128xbf16>, vector<128x128xbf16>, vector<20x128xf32> -> vector<20x128xf32>
    %c4_64 = arith.constant 4 : index
    %c0_65 = arith.constant 0 : index
    %c0_66 = arith.constant 0 : index
    %146 = vector.load %arg3[%c4_64, %c0_65, %c0_66] : memref<5x128x128xbf16, #tpu.memory_space<vmem>>, vector<1x128x128xbf16>
    %147 = vector.shape_cast %146 : vector<1x128x128xbf16> to vector<128x128xbf16>
    %cst_67 = arith.constant dense<0.000000e+00> : vector<20x128xf32>
    %148 = tpu.matmul %133, %147, %cst_67 {dimension_numbers = #tpu.dot_dimension_numbers<[1], [0], [0], [1], [0, 0, 1, 1], [], []>} : vector<20x128xbf16>, vector<128x128xbf16>, vector<20x128xf32> -> vector<20x128xf32>
    %149 = vector.extract_strided_slice %136 {offsets = [0, 0], sizes = [6, 128], strides = [1, 1]} : vector<20x128xf32> to vector<6x128xf32>
    %150 = vector.extract_strided_slice %139 {offsets = [1, 0], sizes = [6, 128], strides = [1, 1]} : vector<20x128xf32> to vector<6x128xf32>
    %151 = arith.addf %149, %150 : vector<6x128xf32>
    %152 = vector.extract_strided_slice %142 {offsets = [2, 0], sizes = [6, 128], strides = [1, 1]} : vector<20x128xf32> to vector<6x128xf32>
    %153 = arith.addf %151, %152 : vector<6x128xf32>
    %154 = vector.extract_strided_slice %145 {offsets = [3, 0], sizes = [6, 128], strides = [1, 1]} : vector<20x128xf32> to vector<6x128xf32>
    %155 = arith.addf %153, %154 : vector<6x128xf32>
    %156 = vector.extract_strided_slice %148 {offsets = [4, 0], sizes = [6, 128], strides = [1, 1]} : vector<20x128xf32> to vector<6x128xf32>
    %157 = arith.addf %155, %156 : vector<6x128xf32>
    %158 = vector.broadcast %1 : vector<1x128xf32> to vector<6x128xf32>
    %159 = arith.addf %157, %158 : vector<6x128xf32>
    %160 = vector.extract_strided_slice %159 {offsets = [0, 16], sizes = [6, 112], strides = [1, 1]} : vector<6x128xf32> to vector<6x112xf32>
    %161 = vector.extract_strided_slice %159 {offsets = [0, 0], sizes = [6, 16], strides = [1, 1]} : vector<6x128xf32> to vector<6x16xf32>
    %162 = tpu.concatenate %160, %161 in 1 : vector<6x112xf32>, vector<6x16xf32> -> vector<6x128xf32>
    %163 = arith.maximumf %159, %162 : vector<6x128xf32>
    %164 = vector.extract_strided_slice %163 {offsets = [0, 0], sizes = [1, 128], strides = [1, 1]} : vector<6x128xf32> to vector<1x128xf32>
    %165 = vector.extract_strided_slice %163 {offsets = [1, 0], sizes = [1, 128], strides = [1, 1]} : vector<6x128xf32> to vector<1x128xf32>
    %166 = arith.maximumf %164, %165 : vector<1x128xf32>
    %167 = vector.extract_strided_slice %163 {offsets = [2, 0], sizes = [1, 128], strides = [1, 1]} : vector<6x128xf32> to vector<1x128xf32>
    %168 = vector.extract_strided_slice %163 {offsets = [3, 0], sizes = [1, 128], strides = [1, 1]} : vector<6x128xf32> to vector<1x128xf32>
    %169 = arith.maximumf %167, %168 : vector<1x128xf32>
    %170 = vector.extract_strided_slice %163 {offsets = [4, 0], sizes = [1, 128], strides = [1, 1]} : vector<6x128xf32> to vector<1x128xf32>
    %171 = vector.extract_strided_slice %163 {offsets = [5, 0], sizes = [1, 128], strides = [1, 1]} : vector<6x128xf32> to vector<1x128xf32>
    %172 = arith.maximumf %170, %171 : vector<1x128xf32>
    %173 = tpu.concatenate %166, %169, %172 in 1 : vector<1x128xf32>, vector<1x128xf32>, vector<1x128xf32> -> vector<1x384xf32>
    %174 = vector.extract_strided_slice %136 {offsets = [10, 0], sizes = [6, 128], strides = [1, 1]} : vector<20x128xf32> to vector<6x128xf32>
    %175 = vector.extract_strided_slice %139 {offsets = [11, 0], sizes = [6, 128], strides = [1, 1]} : vector<20x128xf32> to vector<6x128xf32>
    %176 = arith.addf %174, %175 : vector<6x128xf32>
    %177 = vector.extract_strided_slice %142 {offsets = [12, 0], sizes = [6, 128], strides = [1, 1]} : vector<20x128xf32> to vector<6x128xf32>
    %178 = arith.addf %176, %177 : vector<6x128xf32>
    %179 = vector.extract_strided_slice %145 {offsets = [13, 0], sizes = [6, 128], strides = [1, 1]} : vector<20x128xf32> to vector<6x128xf32>
    %180 = arith.addf %178, %179 : vector<6x128xf32>
    %181 = vector.extract_strided_slice %148 {offsets = [14, 0], sizes = [6, 128], strides = [1, 1]} : vector<20x128xf32> to vector<6x128xf32>
    %182 = arith.addf %180, %181 : vector<6x128xf32>
    %183 = vector.broadcast %1 : vector<1x128xf32> to vector<6x128xf32>
    %184 = arith.addf %182, %183 : vector<6x128xf32>
    %185 = vector.extract_strided_slice %184 {offsets = [0, 16], sizes = [6, 112], strides = [1, 1]} : vector<6x128xf32> to vector<6x112xf32>
    %186 = vector.extract_strided_slice %184 {offsets = [0, 0], sizes = [6, 16], strides = [1, 1]} : vector<6x128xf32> to vector<6x16xf32>
    %187 = tpu.concatenate %185, %186 in 1 : vector<6x112xf32>, vector<6x16xf32> -> vector<6x128xf32>
    %188 = arith.maximumf %184, %187 : vector<6x128xf32>
    %189 = vector.extract_strided_slice %188 {offsets = [0, 0], sizes = [1, 128], strides = [1, 1]} : vector<6x128xf32> to vector<1x128xf32>
    %190 = vector.extract_strided_slice %188 {offsets = [1, 0], sizes = [1, 128], strides = [1, 1]} : vector<6x128xf32> to vector<1x128xf32>
    %191 = arith.maximumf %189, %190 : vector<1x128xf32>
    %192 = vector.extract_strided_slice %188 {offsets = [2, 0], sizes = [1, 128], strides = [1, 1]} : vector<6x128xf32> to vector<1x128xf32>
    %193 = vector.extract_strided_slice %188 {offsets = [3, 0], sizes = [1, 128], strides = [1, 1]} : vector<6x128xf32> to vector<1x128xf32>
    %194 = arith.maximumf %192, %193 : vector<1x128xf32>
    %195 = vector.extract_strided_slice %188 {offsets = [4, 0], sizes = [1, 128], strides = [1, 1]} : vector<6x128xf32> to vector<1x128xf32>
    %196 = vector.extract_strided_slice %188 {offsets = [5, 0], sizes = [1, 128], strides = [1, 1]} : vector<6x128xf32> to vector<1x128xf32>
    %197 = arith.maximumf %195, %196 : vector<1x128xf32>
    %198 = tpu.concatenate %191, %194, %197 in 1 : vector<1x128xf32>, vector<1x128xf32>, vector<1x128xf32> -> vector<1x384xf32>
    %199 = tpu.concatenate %173, %198 in 0 : vector<1x384xf32>, vector<1x384xf32> -> vector<2x384xf32>
    %200 = arith.truncf %199 : vector<2x384xf32> to vector<2x384xbf16>
    %c0_68 = arith.constant 0 : index
    %c0_69 = arith.constant 0 : index
    %201 = vector.load %arg4[%c0_68, %c0_69] : memref<384x128xbf16, #tpu.memory_space<vmem>>, vector<384x128xbf16>
    %cst_70 = arith.constant dense<0.000000e+00> : vector<2x128xf32>
    %202 = tpu.matmul %200, %201, %cst_70 {dimension_numbers = #tpu.dot_dimension_numbers<[1], [0], [0], [1], [0, 0, 1, 1], [], []>} : vector<2x384xbf16>, vector<384x128xbf16>, vector<2x128xf32> -> vector<2x128xf32>
    %203 = vector.broadcast %2 : vector<1x128xf32> to vector<2x128xf32>
    %204 = arith.addf %202, %203 : vector<2x128xf32>
    %cst_71 = arith.constant 0.000000e+00 : f32
    %205 = vector.broadcast %cst_71 : f32 to vector<2x128xf32>
    %206 = arith.subf %205, %204 : vector<2x128xf32>
    %207 = math.exp %206 : vector<2x128xf32>
    %cst_72 = arith.constant 1.000000e+00 : f32
    %208 = vector.broadcast %cst_72 : f32 to vector<2x128xf32>
    %209 = arith.addf %208, %207 : vector<2x128xf32>
    %210 = tpu.reciprocal %209 {approx = true} : vector<2x128xf32> -> vector<2x128xf32>
    %211 = arith.truncf %210 : vector<2x128xf32> to vector<2x128xbf16>
    %c0_73 = arith.constant 0 : index
    %c0_74 = arith.constant 0 : index
    %212 = vector.load %arg5[%c0_73, %c0_74] : memref<128x128xbf16, #tpu.memory_space<vmem>>, vector<128x128xbf16>
    %cst_75 = arith.constant dense<0.000000e+00> : vector<2x128xf32>
    %213 = tpu.matmul %211, %212, %cst_75 {dimension_numbers = #tpu.dot_dimension_numbers<[1], [0], [0], [1], [0, 0, 1, 1], [], []>} : vector<2x128xbf16>, vector<128x128xbf16>, vector<2x128xf32> -> vector<2x128xf32>
    %214 = vector.broadcast %3 : vector<1x128xf32> to vector<2x128xf32>
    %215 = arith.addf %213, %214 : vector<2x128xf32>
    %cst_76 = arith.constant 0.000000e+00 : f32
    %216 = vector.broadcast %cst_76 : f32 to vector<2x128xf32>
    %217 = arith.subf %216, %215 : vector<2x128xf32>
    %218 = math.exp %217 : vector<2x128xf32>
    %cst_77 = arith.constant 1.000000e+00 : f32
    %219 = vector.broadcast %cst_77 : f32 to vector<2x128xf32>
    %220 = arith.addf %219, %218 : vector<2x128xf32>
    %221 = tpu.reciprocal %220 : vector<2x128xf32> -> vector<2x128xf32>
    %c0_78 = arith.constant 0 : index
    %c0_79 = arith.constant 0 : index
    %222 = vector.load %arg7[%c0_78, %c0_79] : memref<2x128xf32, #tpu.memory_space<vmem>>, vector<2x128xf32>
    tpu.vector_store %arg7[%c0_78, %c0_79], %221 {strides = array<i32>} : memref<2x128xf32, #tpu.memory_space<vmem>>, vector<2x128xf32>,
    return
  }
  func.func @transform_0(%arg0: i32) -> (i32, i32, i32) {
    %c0_i32 = arith.constant 0 : i32
    %c0_i32_0 = arith.constant 0 : i32
    %c0_i32_1 = arith.constant 0 : i32
    %c0_i32_2 = arith.constant 0 : i32
    return %c0_i32, %c0_i32_0, %c0_i32_1 : i32, i32, i32
  }
  func.func @transform_1(%arg0: i32) -> (i32, i32, i32) {
    %c0_i32 = arith.constant 0 : i32
    %c0_i32_0 = arith.constant 0 : i32
    %c0_i32_1 = arith.constant 0 : i32
    %c0_i32_2 = arith.constant 0 : i32
    return %c0_i32, %c0_i32_0, %c0_i32_1 : i32, i32, i32
  }
  func.func @transform_2(%arg0: i32) -> (i32, i32, i32) {
    %c0_i32 = arith.constant 0 : i32
    %c0_i32_0 = arith.constant 0 : i32
    %c0_i32_1 = arith.constant 0 : i32
    %c0_i32_2 = arith.constant 0 : i32
    return %c0_i32, %c0_i32_0, %c0_i32_1 : i32, i32, i32
  }
  func.func @transform_3(%arg0: i32) -> (i32, i32) {
    %c0_i32 = arith.constant 0 : i32
    %c0_i32_0 = arith.constant 0 : i32
    %c0_i32_1 = arith.constant 0 : i32
    return %c0_i32, %c0_i32_0 : i32, i32
  }
  func.func @transform_4(%arg0: i32) -> (i32, i32) {
    %c0_i32 = arith.constant 0 : i32
    %c0_i32_0 = arith.constant 0 : i32
    %c0_i32_1 = arith.constant 0 : i32
    return %c0_i32, %c0_i32_0 : i32, i32
  }
  func.func @transform_5(%arg0: i32) -> (i32, i32) {
    %c0_i32 = arith.constant 0 : i32
    %c0_i32_0 = arith.constant 0 : i32
    %c0_i32_1 = arith.constant 0 : i32
    return %c0_i32, %c0_i32_0 : i32, i32
  }
  func.func @transform_6(%arg0: i32) -> (i32, i32) {
    %c0_i32 = arith.constant 0 : i32
    %c0_i32_0 = arith.constant 0 : i32
    %c0_i32_1 = arith.constant 0 : i32
    return %c0_i32, %c0_i32_0 : i32, i32
  }
}

</mosaic_0001>

<bundles_post_ra>
// kernel: blink_forward.1
= control target key start
LH: loop header
LB: loop body
LE: loop exit
PB: predicated region body
PF: predicated region fallthrough
CT: control target
= control target key end

     0   :  { %11 = vsyncpa [#allocation3], 0  ;;  %s2952_s0 = inlined_call_operand.hbm [shape: f32[2,24,24], index: 0, kind: input, shape index: {}]   ;;  %s2953_s1 = inlined_call_operand.hbm [shape: bf16[5,24,128], index: 1, kind: input, shape index: {}]   ;;  %s2954_s2 = inlined_call_operand.hbm [shape: bf16[5,128,128], index: 2, kind: input, shape index: {}]   ;;  %s2955_s3 = inlined_call_operand.hbm [shape: bf16[384,128], index: 3, kind: input, shape index: {}]   ;;  %s2956_s4 = inlined_call_operand.hbm [shape: bf16[128,128], index: 4, kind: input, shape index: {}]   ;;  %s2957_s5 = inlined_call_operand.vmem [shape: f32[4,128], index: 5, kind: input, shape index: {}]   ;;  %s2958_s6 = inlined_call_operand.vmem [shape: f32[2,128], index: 6, kind: output, shape index: {}]  }
   0x1   :  { %12 = vsyncpa [#allocation5], 0 }
   0x2   :  { %13 = vsyncpa [#allocation8], 0  ;;  %s2689_s21 = smov [#allocation4]   ;;  %s2573_s25 = scalar_lea.hbm %s2953_s1, 960 }
   0x3   :  { %s31_s22 = sshll.u32 %s2689_s21, 4  ;;  %p2574_p0 = scmp.ne.s32.totalorder %s2953_s1, %s2573_s25  ;;  %s32_s22 = int_to_ptr.vmem [resolvable:$true] %s31_s22 }
   0x4   :  { %p2577_p1 = scmp.lt.u32.totalorder %s2573_s25, %s2953_s1 }
   0x6   :  { %p2579_p2 = pnand %p2577_p1, %p2574_p0 }
   0x8   :  { %2582 = shalt.err (!%p2579_p2)
}
   0x9   :  { %s2583_s30 = scalar_lea.vmem %s32_s22, 960  ;;  %p2588_p4 = scmp.lt.s32.totalorder %s32_s22, %s32_s22 }
   0xa   :  { %p2584_p3 = scmp.ne.s32.totalorder %s32_s22, %s2583_s30  ;;  %p2589_p5 = scmp.lt.s32.totalorder %s2583_s30, %s2583_s30 }
   0xc   :  { %p2590_p6 = por %p2589_p5, %p2588_p4 }
   0xe   :  { %p2591_p7 = pnand %p2590_p6, %p2584_p3 }
  0x10   :  { %2594 = shalt.err (!%p2591_p7)
}
  0x11   :  { %s2690_s7 = smov 64   ;;  %s2691_s8 = smov 4  }
  0x12   :  { %37 = dma.hbm_to_vmem [thread:$0]  %s2953_s1, 960, %s32_s22, [#allocation5], %s2690_s7, %s2690_s7, %s2691_s8  }
  0x13   :  { %s2692_s11 = smov [#allocation7]   ;;  %s2693_s13 = smov [#allocation2]  }
  0x14   :  { %s55_s12 = sshll.u32 %s2692_s11, 4  ;;  %s19_s14 = sshll.u32 %s2693_s13, 4  ;;  %s56_s12 = int_to_ptr.vmem [resolvable:$true] %s55_s12  ;;  %s20_s14 = int_to_ptr.vmem [resolvable:$true] %s19_s14 }
  0x15   :  { %s2595_s17 = scalar_lea.hbm %s2955_s3, 3072 }
  0x16   :  { %p2596_p8 = scmp.ne.s32.totalorder %s2955_s3, %s2595_s17  ;;  %p2599_p9 = scmp.lt.u32.totalorder %s2595_s17, %s2955_s3 }
  0x18   :  { %p2601_p10 = pnand %p2599_p9, %p2596_p8 }
  0x1a   :  { %2604 = shalt.err (!%p2601_p10)
}
  0x1b   :  { %s2605_s1 = scalar_lea.vmem %s56_s12, 3072  ;;  %p2610_p12 = scmp.lt.s32.totalorder %s56_s12, %s56_s12 }
  0x1c   :  { %p2606_p11 = scmp.ne.s32.totalorder %s56_s12, %s2605_s1  ;;  %p2611_p13 = scmp.lt.s32.totalorder %s2605_s1, %s2605_s1 }
  0x1e   :  { %p2612_p0 = por %p2611_p13, %p2610_p12 }
  0x20   :  { %p2613_p1 = pnand %p2612_p0, %p2606_p11 }
  0x22   :  { %2616 = shalt.err (!%p2613_p1)
}
  0x23   :  { %61 = dma.hbm_to_vmem [thread:$0]  %s2955_s3, 3072, %s56_s12, [#allocation8], %s2690_s7, %s2690_s7, %s2691_s8  }
  0x24   :  { %s2617_s26 = scalar_lea.hbm %s2952_s0, 768 }
  0x25   :  { %p2618_p2 = scmp.ne.s32.totalorder %s2952_s0, %s2617_s26  ;;  %p2621_p3 = scmp.lt.u32.totalorder %s2617_s26, %s2952_s0 }
  0x27   :  { %p2623_p4 = pnand %p2621_p3, %p2618_p2 }
  0x29   :  { %2626 = shalt.err (!%p2623_p4)
}
  0x2a   :  { %s2627_s9 = scalar_lea.vmem %s20_s14, 768  ;;  %p2632_p6 = scmp.lt.s32.totalorder %s20_s14, %s20_s14 }
  0x2b   :  { %p2628_p5 = scmp.ne.s32.totalorder %s20_s14, %s2627_s9  ;;  %p2633_p7 = scmp.lt.s32.totalorder %s2627_s9, %s2627_s9 }
  0x2d   :  { %p2634_p8 = por %p2633_p7, %p2632_p6 }
  0x2f   :  { %p2635_p9 = pnand %p2634_p8, %p2628_p5 }
  0x31   :  { %2638 = shalt.err (!%p2635_p9)
}
  0x32   :  { %s2694_s3 = smov 128   ;;  %s2695_s10 = smov 8  }
  0x33   :  { %25 = dma.hbm_to_vmem [thread:$0]  %s2952_s0, 768, %s20_s14, [#allocation3], %s2694_s3, %s2694_s3, %s2695_s10  }
  0x34   :  { %s2696_s13 = smov [#allocation6]   ;;  %s2697_s16 = smov [#allocation9]  }
  0x35   :  { %s43_s15 = sshll.u32 %s2696_s13, 4  ;;  %s67_s17 = sshll.u32 %s2697_s16, 4  ;;  %s44_s15 = int_to_ptr.vmem [resolvable:$true] %s43_s15  ;;  %s68_s17 = int_to_ptr.vmem [resolvable:$true] %s67_s17 }
  0x36   :  { %s2639_s20 = scalar_lea.hbm %s2954_s2, 5120 }
  0x37   :  { %p2640_p10 = scmp.ne.s32.totalorder %s2954_s2, %s2639_s20  ;;  %p2643_p11 = scmp.lt.u32.totalorder %s2639_s20, %s2954_s2 }
  0x39   :  { %p2645_p12 = pnand %p2643_p11, %p2640_p10 }
  0x3b   :  { %2648 = shalt.err (!%p2645_p12)
}
  0x3c   :  { %s2649_s0 = scalar_lea.vmem %s44_s15, 5120  ;;  %p2654_p0 = scmp.lt.s32.totalorder %s44_s15, %s44_s15 }
  0x3d   :  { %p2650_p13 = scmp.ne.s32.totalorder %s44_s15, %s2649_s0  ;;  %p2655_p1 = scmp.lt.s32.totalorder %s2649_s0, %s2649_s0 }
  0x3f   :  { %p2656_p2 = por %p2655_p1, %p2654_p0 }
  0x41   :  { %p2657_p3 = pnand %p2656_p2, %p2650_p13 }
  0x43   :  { %2660 = shalt.err (!%p2657_p3)
}
  0x44   :  { %49 = dma.hbm_to_vmem [thread:$0]  %s2954_s2, 5120, %s44_s15, [#allocation5], %s2690_s7, %s2690_s7, %s2691_s8  }
  0x45   :  { %s2661_s27 = scalar_lea.hbm %s2956_s4, 1024 }
  0x46   :  { %p2662_p4 = scmp.ne.s32.totalorder %s2956_s4, %s2661_s27  ;;  %p2665_p5 = scmp.lt.u32.totalorder %s2661_s27, %s2956_s4 }
  0x48   :  { %p2667_p6 = pnand %p2665_p5, %p2662_p4 }
  0x4a   :  { %2670 = shalt.err (!%p2667_p6)
}
  0x4b   :  { %s2671_s3 = scalar_lea.vmem %s68_s17, 1024  ;;  %p2676_p8 = scmp.lt.s32.totalorder %s68_s17, %s68_s17 }
  0x4c   :  { %p2672_p7 = scmp.ne.s32.totalorder %s68_s17, %s2671_s3  ;;  %p2677_p9 = scmp.lt.s32.totalorder %s2671_s3, %s2671_s3 }
  0x4e   :  { %p2678_p10 = por %p2677_p9, %p2676_p8 }
  0x50   :  { %p2679_p11 = pnand %p2678_p10, %p2672_p7 }
  0x52   :  { %2682 = shalt.err (!%p2679_p11)
}
  0x53   :  { %73 = dma.hbm_to_vmem [thread:$0]  %s2956_s4, 1024, %s68_s17, [#allocation8], %s2690_s7, %s2690_s7, %s2691_s8  }
  0x54   :  { %2683 = dma.done.wait [#allocation3], 768  }
  0x55   :  { %2684 = vsyncadd [#allocation3], 4294966528 }
  0x56   :  { %2685 = dma.done.wait [#allocation5], 6080  }
  0x57   :  { %2686 = vsyncadd [#allocation5], 4294961216 }
  0x58   :  { %2687 = dma.done.wait [#allocation8], 4096  }
  0x59   :  { %2688 = vsyncadd [#allocation8], 4294963200  ;;  %v2483_v0 = vld [vmem:[#allocation4] sm:$0xff]   ;;  %v2809_v1 = vld [vmem:[#allocation4 + $0xc] sm:$0xff]   ;;  %vm120_vm0 = vcmask 1043456   ;;  %vm113_vm1 = vcmask 195584  }
  0x5a   :  { %2220 = vmatprep.subr.bf16.mxu0 %v2483_v0  ;;  %v2485_v2 = vld [vmem:[#allocation4 + $0x8] ss:$0 sps:$4 sm:$0xff]   ;;  %2228 = vmatprep.subr.bf16.mxu1 %v2809_v1  ;;  %v2486_v3 = vld [vmem:[#allocation4 + $0x14] ss:$0 sps:$4 sm:$0xff]   ;;  %v97_v5 = vld [vmem:[#allocation2 + $0x8] sm:$0xff]  ;;  %vm239_vm2 = vcmask 1046528  }
  0x5b   :  { %2221 = vmatpush3.bf16.msra.mxu0 %v2483_v0  ;;  %v96_v4 = vld [vmem:[#allocation2] sm:$0xff]  ;;  %2229 = vmatpush3.bf16.msra.mxu1 %v2809_v1  ;;  %v122_v6 = vsel %vm120_vm0, %v2485_v2, 0  ;;  %v98_v8 = vld [vmem:[#allocation2 + $0x10] sm:$0xff]  ;;  %v186_v9 = vsel %vm120_vm0, %v2486_v3, 0  ;;  %v2487_v10 = vld [vmem:[#allocation4 + $0x18] sm:$0xff]   ;;  %vm318_vm3 = vcmask 1045504  }
  0x5c   :  { %2440 = vmatprep.subr.msk.bf16.mxu0 %vm120_vm0, %v2485_v2  ;;  %v99_v7 = vpack.c.bf16 %v97_v5, %v96_v4  ;;  %2441 = vmatprep.subr.msk.bf16.mxu1 %vm120_vm0, %v2486_v3  ;;  %v100_v11 = vpack.c.bf16 %v98_v8, %v98_v8  ;;  %v2488_v12 = vld [vmem:[#allocation4 + $0x24] sm:$0xff]   ;;  %v2489_v13 = vld [vmem:[#allocation4 + $0x20] ss:$0 sps:$4 sm:$0xff]   ;;  %v2490_v14 = vld [vmem:[#allocation4 + $0x2c] ss:$0 sps:$4 sm:$0xff]   ;;  %vm397_vm4 = vcmask 1044480  }
  0x5d   :  { %v2492_v15 = vld [vmem:[#allocation4 + $0x38] ss:$0 sps:$4 sm:$0xff]   ;;  %v265_v16 = vsel %vm120_vm0, %v2489_v13, 0  ;;  %v2491_v17 = vld [vmem:[#allocation4 + $0x30] sm:$0xff]   ;;  %v344_v18 = vsel %vm120_vm0, %v2490_v14, 0  ;;  %v552_v20 = vld [vmem:[#allocation2 + $0x18] sm:$0xff] }
  0x5e   :  { %2224 = vmatprep.mubr.msk.bf16.mxu0 %vm113_vm1, %v99_v7  ;;  %2232 = vmatprep.mubr.msk.bf16.mxu1 %vm113_vm1, %v99_v7  ;;  %v423_v19 = vsel %vm120_vm0, %v2492_v15, 0  ;;  %v553_v21 = vld [vmem:[#allocation2 + $0x20] sm:$0xff]  ;;  %v554_v23 = vld [vmem:[#allocation2 + $0x28] sm:$0xff]  ;;  %v2495_v27 = vld [vmem:[#allocation6 + $0x8] sm:$0xff]   ;;  %s2698_s8 = smov 122   ;;  %vm540_vm5 = vcmask 1040384  }
  0x5f   :  { %2223 = vmatpush3.bf16.msra.mxu0 %v122_v6  ;;  %2231 = vmatpush3.bf16.msra.mxu1 %v186_v9  ;;  %v555_v22 = vpack.c.bf16 %v553_v21, %v552_v20  ;;  %v556_v24 = vpack.c.bf16 %v554_v23, %v554_v23  ;;  %v2493_v25 = vld [vmem:[#allocation6] sm:$0xff]   ;;  %v2496_v28 = vld [vmem:[#allocation6 + $0x48] sm:$0xff]   ;;  %vm542_vm6 = vcmask 1041408   ;;  %vm544_vm7 = vcmask 1042432   ;;  %s2701_s13 = smov 112  }
  0x60   :  { %2236 = vmatprep.subr.bf16.mxu0 %v2487_v10  ;;  %2244 = vmatprep.subr.bf16.mxu1 %v2488_v12  ;;  %v2494_v26 = vld [vmem:[#allocation6 + $0x40] sm:$0xff]   ;;  %vm2700_vm8 = vmmov 0  }
  0x62   :  { %2225 = vmatmul.mubr.msk.bf16.vlgmr.msra.gmra.mrb[0].mxu0 %vm113_vm1, %v100_v11  ;;  %2233 = vmatmul.mubr.msk.bf16.vlgmr.msra.gmra.mrb[0].mxu1 %vm113_vm1, %v100_v11 }
  0x63   :  { %2237 = vmatpush3.bf16.msra.mxu0 %v2487_v10  ;;  %2245 = vmatpush3.bf16.msra.mxu1 %v2488_v12 }
  0x64   :  { %2442 = vmatprep.subr.msk.bf16.mxu0 %vm120_vm0, %v2489_v13  ;;  %2443 = vmatprep.subr.msk.bf16.mxu1 %vm120_vm0, %v2490_v14 }
  0x65   :  { %2240 = vmatprep.mubr.msk.bf16.mxu0 %vm113_vm1, %v99_v7  ;;  %2248 = vmatprep.mubr.msk.bf16.mxu1 %vm113_vm1, %v99_v7 }
  0x67   :  { %2239 = vmatpush3.bf16.msra.mxu0 %v265_v16  ;;  %2247 = vmatpush3.bf16.msra.mxu1 %v344_v18 }
  0x68   :  { %2252 = vmatprep.subr.bf16.mxu0 %v2491_v17  ;;  %2260 = vmatprep.subr.bf16.mxu1 %v2483_v0 }
  0x6a   :  { %2241 = vmatmul.mubr.msk.bf16.vlgmr.msra.gmra.mrb[4].mxu0 %vm113_vm1, %v100_v11  ;;  %2249 = vmatmul.mubr.msk.bf16.vlgmr.msra.gmra.mrb[4].mxu1 %vm113_vm1, %v100_v11 }
  0x6b   :  { %2253 = vmatpush3.bf16.msra.mxu0 %v2491_v17  ;;  %2261 = vmatpush3.bf16.msra.mxu1 %v2483_v0 }
  0x6c   :  { %2444 = vmatprep.subr.msk.bf16.mxu0 %vm120_vm0, %v2492_v15  ;;  %2445 = vmatprep.subr.msk.bf16.mxu1 %vm120_vm0, %v2485_v2 }
  0x6d   :  { %2256 = vmatprep.mubr.msk.bf16.mxu0 %vm113_vm1, %v99_v7  ;;  %2264 = vmatprep.mubr.msk.bf16.mxu1 %vm113_vm1, %v555_v22 }
  0x6f   :  { %2255 = vmatpush3.bf16.msra.mxu0 %v423_v19  ;;  %2263 = vmatpush3.bf16.msra.mxu1 %v122_v6 }
  0x70   :  { %2268 = vmatprep.subr.bf16.mxu0 %v2809_v1  ;;  %2276 = vmatprep.subr.bf16.mxu1 %v2487_v10 }
  0x72   :  { %2257 = vmatmul.mubr.msk.bf16.vlgmr.msra.gmra.mrb[8].mxu0 %vm113_vm1, %v100_v11  ;;  %2265 = vmatmul.mubr.msk.bf16.vlgmr.msra.gmra.mrb[8].mxu1 %vm113_vm1, %v556_v24 }
  0x73   :  { %2269 = vmatpush3.bf16.msra.mxu0 %v2809_v1  ;;  %2277 = vmatpush3.bf16.msra.mxu1 %v2487_v10 }
  0x74   :  { %2446 = vmatprep.subr.msk.bf16.mxu0 %vm120_vm0, %v2486_v3  ;;  %2447 = vmatprep.subr.msk.bf16.mxu1 %vm120_vm0, %v2489_v13 }
  0x75   :  { %2272 = vmatprep.mubr.msk.bf16.mxu0 %vm113_vm1, %v555_v22  ;;  %2280 = vmatprep.mubr.msk.bf16.mxu1 %vm113_vm1, %v555_v22 }
  0x77   :  { %2271 = vmatpush3.bf16.msra.mxu0 %v186_v9  ;;  %2279 = vmatpush3.bf16.msra.mxu1 %v265_v16 }
  0x78   :  { %2284 = vmatprep.subr.bf16.mxu0 %v2488_v12  ;;  %2292 = vmatprep.subr.bf16.mxu1 %v2491_v17 }
  0x7a   :  { %2273 = vmatmul.mubr.msk.bf16.vlgmr.msra.gmra.mrb[12].mxu0 %vm113_vm1, %v556_v24  ;;  %2281 = vmatmul.mubr.msk.bf16.vlgmr.msra.gmra.mrb[12].mxu1 %vm113_vm1, %v556_v24 }
  0x7b   :  { %2285 = vmatpush3.bf16.msra.mxu0 %v2488_v12  ;;  %2293 = vmatpush3.bf16.msra.mxu1 %v2491_v17 }
  0x7c   :  { %2448 = vmatprep.subr.msk.bf16.mxu0 %vm120_vm0, %v2490_v14  ;;  %2449 = vmatprep.subr.msk.bf16.mxu1 %vm120_vm0, %v2492_v15 }
  0x7d   :  { %2288 = vmatprep.mubr.msk.bf16.mxu0 %vm113_vm1, %v555_v22  ;;  %2296 = vmatprep.mubr.msk.bf16.mxu1 %vm113_vm1, %v555_v22 }
  0x7f   :  { %2287 = vmatpush3.bf16.msra.mxu0 %v344_v18  ;;  %2295 = vmatpush3.bf16.msra.mxu1 %v423_v19 }
  0x80   :  { %2300 = vmatprep.subr.bf16.mxu0 %v2493_v25  ;;  %2320 = vmatprep.subr.bf16.mxu1 %v2494_v26 }
  0x82   :  { %2289 = vmatmul.mubr.msk.bf16.vlgmr.msra.gmra.mrb[16].mxu0 %vm113_vm1, %v556_v24  ;;  %2297 = vmatmul.mubr.msk.bf16.vlgmr.msra.gmra.mrb[16].mxu1 %vm113_vm1, %v556_v24 }
  0x83   :  { %2301 = vmatpush3.bf16.msra.mxu0 %v2493_v25  ;;  %2321 = vmatpush3.bf16.msra.mxu1 %v2494_v26 }
  0x84   :  { %2302 = vmatprep.subr.bf16.mxu0 %v2495_v27  ;;  %2322 = vmatprep.subr.bf16.mxu1 %v2496_v28 }
  0x87   :  { %2303 = vmatpush3.bf16.msra.mxu0 %v2495_v27  ;;  %2323 = vmatpush3.bf16.msra.mxu1 %v2496_v28 }
 0x135   :  { %v2226_v29 = vpop.f32.mrb[0].mxu0  ;;  %v2234_v30 = vpop.f32.mrb[0].mxu1 }
 0x136   :  { %v158_v31 = vpop.f32.mrb[1].mxu0  ;;  %v243_v32 = vrot.slane %v2234_v30, 1  ;;  %v222_v33 = vpop.f32.mrb[1].mxu1 }
 0x137   :  { %v2227_v34 = vpop.f32.mrb[2].mxu0  ;;  %v240_v35 = vrot.slane %v222_v33, 1  ;;  %v2235_v36 = vpop.f32.mrb[2].mxu1 }
 0x138   :  { %v161_v37 = vpop.f32.mrb[3].mxu0  ;;  %v250_v38 = vadd.f32 %v2226_v29, %v243_v32  ;;  %v225_v39 = vpop.f32.mrb[3].mxu1 }
 0x139   :  { %v241_v40 = vrot.slane %v225_v39, 1 }
 0x13b   :  { %v242_v41 = vsel %vm239_vm2, %v240_v35, %v241_v40  ;;  %v244_v42 = vsel %vm239_vm2, %v241_v40, %v243_v32 }
 0x13c   :  { %v248_v43 = vadd.f32 %v242_v41, %v158_v31  ;;  %v249_v44 = vadd.f32 %v244_v42, %v161_v37 }
 0x13d   :  { %v2242_v45 = vpop.f32.mrb[4].mxu0  ;;  %v2250_v47 = vpop.f32.mrb[4].mxu1 }
 0x13e   :  { %v322_v46 = vrot.slane %v2242_v45, 2  ;;  %v301_v48 = vpop.f32.mrb[5].mxu0  ;;  %v401_v49 = vrot.slane %v2250_v47, 3  ;;  %v380_v50 = vpop.f32.mrb[5].mxu1  ;;  %v2498_v45 = vld [vmem:[#allocation6 + $0x50] sm:$0xff]  }
 0x13f   :  { %v2243_v51 = vpop.f32.mrb[6].mxu0  ;;  %v398_v53 = vrot.slane %v380_v50, 3  ;;  %v2251_v54 = vpop.f32.mrb[6].mxu1  ;;  %v319_v56 = vrot.slane %v301_v48, 2  ;;  %2324 = vmatprep.subr.bf16.mxu1 %v2498_v45 }
 0x140   :  { %v329_v52 = vadd.f32 %v322_v46, %v250_v38  ;;  %v304_v55 = vpop.f32.mrb[7].mxu0  ;;  %v383_v58 = vpop.f32.mrb[7].mxu1  ;;  %2325 = vmatpush3.bf16.msra.mxu1 %v2498_v45 }
 0x141   :  { %v320_v57 = vrot.slane %v304_v55, 2  ;;  %v399_v60 = vrot.slane %v383_v58, 3 }
 0x142   :  { %v408_v59 = vadd.f32 %v401_v49, %v329_v52 }
 0x143   :  { %v321_v61 = vsel %vm318_vm3, %v319_v56, %v320_v57  ;;  %v323_v62 = vsel %vm318_vm3, %v320_v57, %v322_v46  ;;  %v400_v1 = vsel %vm397_vm4, %v398_v53, %v399_v60  ;;  %v402_v2 = vsel %vm397_vm4, %v399_v60, %v401_v49 }
 0x144   :  { %v327_v63 = vadd.f32 %v321_v61, %v248_v43  ;;  %v328_v0 = vadd.f32 %v323_v62, %v249_v44  ;;  %v2497_v44 = vld [vmem:[#allocation6 + $0x10] sm:$0xff]   ;;  %v2499_v61 = vld [vmem:[#allocation6 + $0x18] sm:$0xff]  }
 0x145   :  { %v2258_v3 = vpop.f32.mrb[8].mxu0  ;;  %v2266_v7 = vpop.f32.mrb[8].mxu1  ;;  %2304 = vmatprep.subr.bf16.mxu0 %v2497_v44  ;;  %v2500_v62 = vld [vmem:[#allocation6 + $0x58] sm:$0xff]  }
 0x146   :  { %v406_v4 = vadd.f32 %v400_v1, %v327_v63  ;;  %v407_v5 = vadd.f32 %v402_v2, %v328_v0  ;;  %v479_v6 = vrot.slane %v2258_v3, 4  ;;  %v459_v8 = vpop.f32.mrb[9].mxu0  ;;  %v597_v9 = vpop.f32.mrb[9].mxu1  ;;  %2305 = vmatpush3.bf16.msra.mxu0 %v2497_v44  ;;  %v2002_v1 = vld [vmem:[%s2957_s5] ss:$0 sm:$0xff]  ;;  %2326 = vmatprep.subr.bf16.mxu1 %v2500_v62 }
 0x147   :  { %v2259_v10 = vpop.f32.mrb[10].mxu0  ;;  %v2267_v12 = vpop.f32.mrb[10].mxu1  ;;  %v476_v14 = vrot.slane %v459_v8, 4  ;;  %2306 = vmatprep.subr.bf16.mxu0 %v2499_v61  ;;  %2327 = vmatpush3.bf16.msra.mxu1 %v2500_v62 }
 0x148   :  { %v2856_v11 = vadd.f32 %v479_v6, %v408_v59  ;;  %v462_v13 = vpop.f32.mrb[11].mxu0  ;;  %v600_v16 = vpop.f32.mrb[11].mxu1 }
 0x149   :  { %v477_v15 = vrot.slane %v462_v13, 4 }
 0x14a   :  { %2307 = vmatpush3.bf16.msra.mxu0 %v2499_v61  ;;  %v493_v8 = vadd.f32 %v2002_v1, %v2856_v11  ;;  %v2504_v11 = vld [vmem:[#allocation6 + $0x68] sm:$0xff]  }
 0x14b   :  { %v478_v17 = vsel %vm120_vm0, %v476_v14, %v477_v15  ;;  %v480_v18 = vsel %vm120_vm0, %v477_v15, %v479_v6  ;;  %v2501_v14 = vld [vmem:[#allocation6 + $0x20] sm:$0xff]  }
 0x14c   :  { %v2860_v19 = vadd.f32 %v480_v18, %v407_v5  ;;  %v2862_v20 = vadd.f32 %v478_v17, %v406_v4  ;;  %v2502_v15 = vld [vmem:[#allocation6 + $0x60] sm:$0xff]   ;;  %2308 = vmatprep.subr.bf16.mxu0 %v2501_v14 }
 0x14d   :  { %v2274_v21 = vpop.f32.mrb[12].mxu0  ;;  %v2282_v23 = vpop.f32.mrb[12].mxu1  ;;  %2328 = vmatprep.subr.bf16.mxu1 %v2502_v15 }
 0x14e   :  { %v665_v22 = vrot.slane %v2274_v21, 1  ;;  %v645_v24 = vpop.f32.mrb[13].mxu0  ;;  %v727_v25 = vrot.slane %v2282_v23, 2  ;;  %v707_v26 = vpop.f32.mrb[13].mxu1  ;;  %2309 = vmatpush3.bf16.msra.mxu0 %v2501_v14  ;;  %2329 = vmatpush3.bf16.msra.mxu1 %v2502_v15  ;;  %v492_v23 = vadd.f32 %v2002_v1, %v2860_v19  ;;  %v2880_v19 = vld [vmem:[#allocation6 + $0xc0] sm:$0xff]  }
 0x14f   :  { %v2275_v27 = vpop.f32.mrb[14].mxu0  ;;  %v724_v29 = vrot.slane %v707_v26, 2  ;;  %v2283_v30 = vpop.f32.mrb[14].mxu1  ;;  %v662_v32 = vrot.slane %v645_v24, 1  ;;  %2330 = vmatprep.subr.bf16.mxu1 %v2504_v11  ;;  %v2507_v26 = vld [vmem:[#allocation6 + $0x38] sm:$0xff]  }
 0x150   :  { %v672_v28 = vadd.f32 %v2266_v7, %v665_v22  ;;  %v648_v31 = vpop.f32.mrb[15].mxu0  ;;  %v710_v34 = vpop.f32.mrb[15].mxu1  ;;  %v2508_v27 = vld [vmem:[#allocation6 + $0x78] sm:$0xff]  }
 0x151   :  { %v663_v33 = vrot.slane %v648_v31, 1  ;;  %v725_v36 = vrot.slane %v710_v34, 2 }
 0x152   :  { %v734_v35 = vadd.f32 %v727_v25, %v672_v28  ;;  %2331 = vmatpush3.bf16.msra.mxu1 %v2504_v11  ;;  %v2878_v28 = vld [vmem:[#allocation6 + $0x80] sm:$0xff]  }
 0x153   :  { %v664_v37 = vsel %vm239_vm2, %v662_v32, %v663_v33  ;;  %v666_v38 = vsel %vm239_vm2, %v663_v33, %v665_v22  ;;  %v726_v41 = vsel %vm318_vm3, %v724_v29, %v725_v36  ;;  %v728_v42 = vsel %vm318_vm3, %v725_v36, %v727_v25  ;;  %v2503_v22 = vld [vmem:[#allocation6 + $0x28] sm:$0xff]   ;;  %v2506_v25 = vld [vmem:[#allocation6 + $0x70] sm:$0xff]  }
 0x154   :  { %v670_v39 = vadd.f32 %v664_v37, %v597_v9  ;;  %v671_v40 = vadd.f32 %v666_v38, %v600_v16  ;;  %v491_v16 = vadd.f32 %v2002_v1, %v2862_v20  ;;  %2310 = vmatprep.subr.bf16.mxu0 %v2503_v22  ;;  %v2505_v20 = vld [vmem:[#allocation6 + $0x30] sm:$0xff]   ;;  %2332 = vmatprep.subr.bf16.mxu1 %v2506_v25 }
 0x155   :  { %v2290_v43 = vpop.f32.mrb[16].mxu0  ;;  %v2298_v49 = vpop.f32.mrb[16].mxu1  ;;  %2311 = vmatpush3.bf16.msra.mxu0 %v2503_v22 }
 0x156   :  { %v732_v46 = vadd.f32 %v726_v41, %v670_v39  ;;  %v733_v47 = vadd.f32 %v728_v42, %v671_v40  ;;  %v789_v48 = vrot.slane %v2290_v43, 3  ;;  %v769_v50 = vpop.f32.mrb[17].mxu0  ;;  %v851_v51 = vrot.slane %v2298_v49, 4  ;;  %v831_v52 = vpop.f32.mrb[17].mxu1  ;;  %2312 = vmatprep.subr.bf16.mxu0 %v2505_v20  ;;  %2333 = vmatpush3.bf16.msra.mxu1 %v2506_v25 }
 0x157   :  { %v2291_v53 = vpop.f32.mrb[18].mxu0  ;;  %v848_v55 = vrot.slane %v831_v52, 4  ;;  %v2299_v56 = vpop.f32.mrb[18].mxu1  ;;  %v786_v58 = vrot.slane %v769_v50, 3  ;;  %2334 = vmatprep.subr.bf16.mxu1 %v2508_v27 }
 0x158   :  { %v796_v54 = vadd.f32 %v789_v48, %v734_v35  ;;  %v772_v57 = vpop.f32.mrb[19].mxu0  ;;  %v834_v60 = vpop.f32.mrb[19].mxu1 }
 0x159   :  { %v787_v59 = vrot.slane %v772_v57, 3  ;;  %v849_v0 = vrot.slane %v834_v60, 4  ;;  %2313 = vmatpush3.bf16.msra.mxu0 %v2505_v20 }
 0x15a   :  { %v858_v63 = vadd.f32 %v851_v51, %v796_v54  ;;  %2314 = vmatprep.subr.bf16.mxu0 %v2507_v26  ;;  %2335 = vmatpush3.bf16.msra.mxu1 %v2508_v27 }
 0x15b   :  { %v788_v2 = vsel %vm397_vm4, %v786_v58, %v787_v59  ;;  %v790_v3 = vsel %vm397_vm4, %v787_v59, %v789_v48  ;;  %v850_v6 = vsel %vm120_vm0, %v848_v55, %v849_v0  ;;  %v852_v7 = vsel %vm120_vm0, %v849_v0, %v851_v51  ;;  %2360 = vmatprep.subr.bf16.mxu1 %v2880_v19 }
 0x15c   :  { %v794_v4 = vadd.f32 %v788_v2, %v732_v46  ;;  %v795_v5 = vadd.f32 %v790_v3, %v733_v47  ;;  %v861_v9 = vadd.f32 %v2002_v1, %v858_v63 }
 0x15d   :  { %2315 = vmatpush3.bf16.msra.mxu0 %v2507_v26 }
 0x15e   :  { %v857_v10 = vadd.f32 %v852_v7, %v795_v5  ;;  %v856_v12 = vadd.f32 %v850_v6, %v794_v4  ;;  %v2473_v13 = vpack.i.bf16 %v493_v8, %v861_v9  ;;  %2340 = vmatprep.subr.bf16.mxu0 %v2878_v28 }
 0x160   :  { %v859_v17 = vadd.f32 %v2002_v1, %v856_v12  ;;  %2474 = vrot.lane.b32.xlu1 %v2473_v13, %s2698_s8  ;;  %v860_v21 = vadd.f32 %v2002_v1, %v857_v10 }
 0x162   :  { %v2463_v18 = vpack.i.bf16 %v491_v16, %v859_v17  ;;  %v2468_v24 = vpack.i.bf16 %v492_v23, %v860_v21 }
 0x164   :  { %2464 = vrot.lane.b32.xlu0 %v2463_v18, %s2698_s8 }
 0x168   :  { %2469 = vrot.lane.b32.xlu0 %v2468_v24, %s2698_s8 }
 0x1d2   :  { %v2475_v29 = vpop.permute.xlu1 %2474 }
 0x1d3   :  { %v2476_v30 = vunpack.i.l.bf16 %v2475_v29  ;;  %v2477_v31 = vunpack.i.h.bf16 %v2475_v29 }
 0x1d5   :  { %v876_v35 = vmax.f32 %v861_v9, %v2476_v30  ;;  %v508_v38 = vmax.f32 %v493_v8, %v2477_v31 }
 0x1d6   :  { %v2465_v32 = vpop.permute.xlu0 %2464 }
 0x1d7   :  { %v2467_v33 = vunpack.i.h.bf16 %v2465_v32  ;;  %v2466_v34 = vunpack.i.l.bf16 %v2465_v32  ;;  %v886_v44 = vrot.slane %v876_v35, 1  ;;  %v518_v49 = vrot.slane %v508_v38, 1  ;;  %v2511_v32 = vld [vmem:[#allocation6 + $0x88] sm:$0xff]  }
 0x1d9   :  { %v506_v36 = vmax.f32 %v491_v16, %v2467_v33  ;;  %v874_v37 = vmax.f32 %v859_v17, %v2466_v34  ;;  %v888_v52 = vmax.f32 %v876_v35, %v886_v44  ;;  %v520_v63 = vmax.f32 %v508_v38, %v518_v49  ;;  %v2512_v33 = vld [vmem:[#allocation6 + $0xc8] sm:$0xff]   ;;  %v2513_v34 = vld [vmem:[#allocation6 + $0x90] sm:$0xff]   ;;  %v2517_v38 = vld [vmem:[#allocation6 + $0xa0] sm:$0xff]  }
 0x1da   :  { %v2470_v39 = vpop.permute.xlu0 %2469  ;;  %v2514_v35 = vld [vmem:[#allocation6 + $0xd0] sm:$0xff]   ;;  %v2525_v44 = vld [vmem:[#allocation6 + $0x100] sm:$0xff]   ;;  %v2530_v49 = vld [vmem:[#allocation6 + $0x128] sm:$0xff]  }
 0x1db   :  { %v510_v40 = vrot.slane %v506_v36, 1  ;;  %v878_v41 = vrot.slane %v874_v37, 1  ;;  %v2472_v42 = vunpack.i.h.bf16 %v2470_v39  ;;  %v2471_v43 = vunpack.i.l.bf16 %v2470_v39  ;;  %v2520_v39 = vld [vmem:[#allocation6 + $0xe8] sm:$0xff]  }
 0x1dc   :  { %v906_v3 = vrot.slane %v888_v52, 1  ;;  %v538_v10 = vrot.slane %v520_v63, 1 }
 0x1dd   :  { %v512_v45 = vmax.f32 %v506_v36, %v510_v40  ;;  %v880_v46 = vmax.f32 %v874_v37, %v878_v41  ;;  %v507_v47 = vmax.f32 %v492_v23, %v2472_v42  ;;  %v875_v48 = vmax.f32 %v860_v21, %v2471_v43  ;;  %v2515_v36 = vld [vmem:[#allocation6 + $0x98] sm:$0xff]   ;;  %v2521_v40 = vld [vmem:[#allocation6 + $0xb0] sm:$0xff]  }
 0x1de   :  { %v915_v15 = vsel %vm540_vm5, %v888_v52, %v906_v3  ;;  %v550_v25 = vsel %vm540_vm5, %v520_v63, %v538_v10  ;;  %v2516_v37 = vld [vmem:[#allocation6 + $0xd8] sm:$0xff]   ;;  %v2522_v41 = vld [vmem:[#allocation6 + $0xf0] sm:$0xff]   ;;  %v2533_v52 = vld [vmem:[#allocation7 + $0x40] sm:$0xff]  }
 0x1df   :  { %v522_v50 = vrot.slane %v512_v45, 1  ;;  %v524_v51 = vrot.slane %v512_v45, 2  ;;  %v890_v53 = vrot.slane %v880_v46, 1  ;;  %v892_v54 = vrot.slane %v880_v46, 2  ;;  %v2523_v42 = vld [vmem:[#allocation6 + $0xb8] sm:$0xff]   ;;  %v2547_v3 = vld [vmem:[#allocation7 + $0x20] sm:$0xff]  }
 0x1e0   :  { %v514_v55 = vrot.slane %v507_v47, 1  ;;  %v526_v56 = vrot.slane %v512_v45, 3  ;;  %v882_v58 = vrot.slane %v875_v48, 1  ;;  %v894_v60 = vrot.slane %v880_v46, 3  ;;  %v2524_v43 = vld [vmem:[#allocation6 + $0xf8] sm:$0xff]  }
 0x1e1   :  { %v541_v57 = vsel %vm540_vm5, %v512_v45, %v522_v50  ;;  %v908_v61 = vsel %vm540_vm5, %v880_v46, %v890_v53  ;;  %v919_v23 = vrot.slane %v915_v15, 6  ;;  %v2526_v45 = vld [vmem:[#allocation6 + $0x108] sm:$0xff]   ;;  %v2527_v46 = vld [vmem:[#allocation6 + $0x110] sm:$0xff]   ;;  %v2534_v53 = vld [vmem:[#allocation7 + $0x80] sm:$0xff]  }
 0x1e2   :  { %v543_v59 = vsel %vm542_vm6, %v541_v57, %v524_v51  ;;  %v516_v62 = vmax.f32 %v507_v47, %v514_v55  ;;  %v909_v1 = vsel %vm542_vm6, %v908_v61, %v892_v54  ;;  %v884_v2 = vmax.f32 %v875_v48, %v882_v58  ;;  %v2528_v47 = vld [vmem:[#allocation6 + $0x118] sm:$0xff]   ;;  %v2529_v48 = vld [vmem:[#allocation6 + $0x120] sm:$0xff]   ;;  %v2531_v50 = vld [vmem:[#allocation6 + $0x130] sm:$0xff]  }
 0x1e3   :  { %v545_v0 = vsel %vm544_vm7, %v543_v59, %v526_v56  ;;  %v910_v4 = vsel %vm544_vm7, %v909_v1, %v894_v60  ;;  %v2532_v51 = vld [vmem:[#allocation6 + $0x138] sm:$0xff]   ;;  %v2535_v54 = vld [vmem:[#allocation7] sm:$0xff]   ;;  %v2699_v55 = vmov 0.0   ;;  %v2536_v56 = vld [vmem:[#allocation7 + $0x48] sm:$0xff]  }
 0x1e4   :  { %v529_v5 = vrot.slane %v516_v62, 4  ;;  %v531_v6 = vrot.slane %v516_v62, 5  ;;  %v897_v7 = vrot.slane %v884_v2, 4  ;;  %v899_v8 = vrot.slane %v884_v2, 5  ;;  %v2537_v57 = vld [vmem:[#allocation7 + $0x88] sm:$0xff]   ;;  %v2539_v59 = vld [vmem:[#allocation7 + $0x50] sm:$0xff]  }
 0x1e5   :  { %v901_v13 = vrot.slane %v884_v2, 6  ;;  %v533_v16 = vrot.slane %v516_v62, 6  ;;  %v903_v17 = vrot.slane %v884_v2, 7  ;;  %v535_v24 = vrot.slane %v516_v62, 7  ;;  %v2538_v58 = vld [vmem:[#allocation7 + $0x8] sm:$0xff]   ;;  %v2540_v60 = vld [vmem:[#allocation7 + $0x90] sm:$0xff]  }
 0x1e6   :  { %v546_v9 = vsel %vm120_vm0, %v545_v0, %v529_v5  ;;  %v911_v14 = vsel %vm120_vm0, %v910_v4, %v897_v7  ;;  %v2541_v61 = vld [vmem:[#allocation7 + $0x10] sm:$0xff]   ;;  %v2542_v62 = vld [vmem:[#allocation7 + $0x58] sm:$0xff]   ;;  %v2545_v1 = vld [vmem:[#allocation7 + $0x60] sm:$0xff]  }
 0x1e7   :  { %v547_v12 = vsel %vm397_vm4, %v546_v9, %v531_v6  ;;  %v912_v18 = vsel %vm397_vm4, %v911_v14, %v899_v8  ;;  %v2543_v63 = vld [vmem:[#allocation7 + $0x98] sm:$0xff]   ;;  %v2546_v2 = vld [vmem:[#allocation7 + $0xa0] sm:$0xff]  }
 0x1e8   :  { %v913_v21 = vsel %vm318_vm3, %v912_v18, %v901_v13  ;;  %v548_v11 = vsel %vm318_vm3, %v547_v12, %v533_v16  ;;  %v2544_v0 = vld [vmem:[#allocation7 + $0x18] sm:$0xff]  }
 0x1e9   :  { %v914_v22 = vsel %vm239_vm2, %v913_v21, %v903_v17  ;;  %v549_v26 = vsel %vm239_vm2, %v548_v11, %v535_v24 }
 0x1ea   :  { %v918_v20 = vrot.slane %v914_v22, 6 }
 0x1ec   :  { %v923_v27 = vsel %vm542_vm6, %v550_v25, %v918_v20  ;;  %v920_v29 = vsel %vm542_vm6, %v918_v20, %v919_v23 }
 0x1ed   :  { %v924_v30 = vpack.c.bf16 %v923_v27, %v549_v26  ;;  %v2902_v31 = vpack.c.bf16 %v920_v29, %v920_v29 }
 0x1ef   :  { %2316 = vmatprep.mubr.bf16.mxu0 %v924_v30  ;;  %2336 = vmatprep.mubr.bf16.mxu1 %v924_v30 }
 0x1f0   :  { %2317 = vmatmul.mubr.bf16.vlgmr.msra.gmra.mrb[20].mxu0 %v2902_v31  ;;  %2337 = vmatmul.mubr.bf16.vlgmr.msra.gmra.mrb[20].mxu1 %v2902_v31 }
 0x1f1   :  { %2341 = vmatpush3.bf16.msra.mxu0 %v2878_v28  ;;  %2361 = vmatpush3.bf16.msra.mxu1 %v2880_v19  ;;  %v2518_v28 = vld [vmem:[#allocation6 + $0xe0] sm:$0xff]   ;;  %v2519_v19 = vld [vmem:[#allocation6 + $0xa8] sm:$0xff]  }
 0x1f2   :  { %2356 = vmatprep.mubr.bf16.mxu0 %v924_v30  ;;  %2376 = vmatprep.mubr.bf16.mxu1 %v924_v30 }
 0x1f3   :  { %2342 = vmatprep.subr.bf16.mxu0 %v2511_v32  ;;  %2362 = vmatprep.subr.bf16.mxu1 %v2512_v33 }
 0x1f5   :  { %2343 = vmatpush3.bf16.msra.mxu0 %v2511_v32  ;;  %2363 = vmatpush3.bf16.msra.mxu1 %v2512_v33 }
 0x1f6   :  { %2344 = vmatprep.subr.bf16.mxu0 %v2513_v34  ;;  %2364 = vmatprep.subr.bf16.mxu1 %v2514_v35 }
 0x1f9   :  { %2345 = vmatpush3.bf16.msra.mxu0 %v2513_v34  ;;  %2365 = vmatpush3.bf16.msra.mxu1 %v2514_v35 }
 0x1fa   :  { %2346 = vmatprep.subr.bf16.mxu0 %v2515_v36  ;;  %2366 = vmatprep.subr.bf16.mxu1 %v2516_v37 }
 0x1fd   :  { %2347 = vmatpush3.bf16.msra.mxu0 %v2515_v36  ;;  %2367 = vmatpush3.bf16.msra.mxu1 %v2516_v37 }
 0x1fe   :  { %2348 = vmatprep.subr.bf16.mxu0 %v2517_v38  ;;  %2368 = vmatprep.subr.bf16.mxu1 %v2518_v28 }
 0x201   :  { %2349 = vmatpush3.bf16.msra.mxu0 %v2517_v38  ;;  %2369 = vmatpush3.bf16.msra.mxu1 %v2518_v28 }
 0x202   :  { %2350 = vmatprep.subr.bf16.mxu0 %v2519_v19  ;;  %2370 = vmatprep.subr.bf16.mxu1 %v2520_v39 }
 0x205   :  { %2351 = vmatpush3.bf16.msra.mxu0 %v2519_v19  ;;  %2371 = vmatpush3.bf16.msra.mxu1 %v2520_v39 }
 0x206   :  { %2352 = vmatprep.subr.bf16.mxu0 %v2521_v40  ;;  %2372 = vmatprep.subr.bf16.mxu1 %v2522_v41 }
 0x209   :  { %2353 = vmatpush3.bf16.msra.mxu0 %v2521_v40  ;;  %2373 = vmatpush3.bf16.msra.mxu1 %v2522_v41  ;;  %v2548_v40 = vld [vmem:[#allocation7 + $0x68] sm:$0xff]  }
 0x20a   :  { %2354 = vmatprep.subr.bf16.mxu0 %v2523_v42  ;;  %2374 = vmatprep.subr.bf16.mxu1 %v2524_v43  ;;  %v2549_v41 = vld [vmem:[#allocation7 + $0xa8] sm:$0xff]  }
 0x20d   :  { %2355 = vmatpush3.bf16.msra.mxu0 %v2523_v42  ;;  %2375 = vmatpush3.bf16.msra.mxu1 %v2524_v43  ;;  %v2550_v43 = vld [vmem:[#allocation7 + $0x28] sm:$0xff]  }
 0x20e   :  { %2380 = vmatprep.subr.bf16.mxu0 %v2525_v44  ;;  %2180 = vmatprep.subr.bf16.mxu1 %v2533_v52 }
 0x210   :  { %2357 = vmatmul.mubr.bf16.vlgmr.msra.gmra.mrb[24].mxu0 %v2902_v31  ;;  %2377 = vmatmul.mubr.bf16.vlgmr.msra.gmra.mrb[24].mxu1 %v2902_v31 }
 0x211   :  { %2381 = vmatpush3.bf16.msra.mxu0 %v2525_v44  ;;  %2396 = vmatprep.mubr.bf16.mxu0 %v924_v30 }
 0x212   :  { %2382 = vmatprep.subr.bf16.mxu0 %v2526_v45  ;;  %2181 = vmatpush3.bf16.msra.mxu1 %v2535_v54  ;;  %v2053_v54 = vld [vmem:[%s2957_s5 + $0x1] ss:$0 sm:$0xff] }
 0x213   :  { %2182 = vmatprep.subr.bf16.mxu1 %v2536_v56 }
 0x215   :  { %2383 = vmatpush3.bf16.msra.mxu0 %v2526_v45 }
 0x216   :  { %2384 = vmatprep.subr.bf16.mxu0 %v2527_v46  ;;  %2183 = vmatpush3.bf16.msra.mxu1 %v2538_v58  ;;  %v2554_v58 = vld [vmem:[#allocation7 + $0x78] sm:$0xff]  }
 0x217   :  { %2184 = vmatprep.subr.bf16.mxu1 %v2539_v59  ;;  %v2555_v59 = vld [vmem:[#allocation7 + $0xb8] sm:$0xff]  }
 0x219   :  { %2385 = vmatpush3.bf16.msra.mxu0 %v2527_v46 }
 0x21a   :  { %2386 = vmatprep.subr.bf16.mxu0 %v2528_v47  ;;  %2185 = vmatpush3.bf16.msra.mxu1 %v2541_v61 }
 0x21b   :  { %2186 = vmatprep.subr.bf16.mxu1 %v2542_v62 }
 0x21d   :  { %2387 = vmatpush3.bf16.msra.mxu0 %v2528_v47 }
 0x21e   :  { %2388 = vmatprep.subr.bf16.mxu0 %v2529_v48  ;;  %2187 = vmatpush3.bf16.msra.mxu1 %v2544_v0 }
 0x21f   :  { %2188 = vmatprep.subr.bf16.mxu1 %v2545_v1 }
 0x221   :  { %2389 = vmatpush3.bf16.msra.mxu0 %v2529_v48 }
 0x222   :  { %2390 = vmatprep.subr.bf16.mxu0 %v2530_v49  ;;  %2189 = vmatpush3.bf16.msra.mxu1 %v2547_v3 }
 0x223   :  { %2190 = vmatprep.subr.bf16.mxu1 %v2548_v40 }
 0x225   :  { %2391 = vmatpush3.bf16.msra.mxu0 %v2530_v49  ;;  %v2551_v49 = vld [vmem:[#allocation7 + $0x70] sm:$0xff]  }
 0x226   :  { %2392 = vmatprep.subr.bf16.mxu0 %v2531_v50  ;;  %2191 = vmatpush3.bf16.msra.mxu1 %v2550_v43 }
 0x227   :  { %2192 = vmatprep.subr.bf16.mxu1 %v2551_v49 }
 0x229   :  { %2393 = vmatpush3.bf16.msra.mxu0 %v2531_v50  ;;  %v2552_v50 = vld [vmem:[#allocation7 + $0xb0] sm:$0xff]  }
 0x22a   :  { %2394 = vmatprep.subr.bf16.mxu0 %v2532_v51 }
 0x22d   :  { %2395 = vmatpush3.bf16.msra.mxu0 %v2532_v51  ;;  %v2553_v51 = vld [vmem:[#allocation7 + $0x30] sm:$0xff]  }
 0x22e   :  { %2400 = vmatprep.subr.bf16.mxu0 %v2699_v55  ;;  %2193 = vmatpush3.bf16.msra.mxu1 %v2553_v51 }
 0x22f   :  { %2194 = vmatprep.subr.bf16.mxu1 %v2554_v58 }
 0x230   :  { %2397 = vmatmul.mubr.bf16.vlgmr.msra.gmra.mrb[28].mxu0 %v2902_v31 }
 0x231   :  { %2401 = vmatpush3.bf16.msra.mxu0 %v2534_v53  ;;  %2416 = vmatprep.mubr.msk.bf16.mxu0 %vm2700_vm8, %v2699_v55 }
 0x232   :  { %2402 = vmatprep.subr.bf16.mxu0 %v2699_v55 }
 0x235   :  { %2403 = vmatpush3.bf16.msra.mxu0 %v2537_v57 }
 0x236   :  { %2404 = vmatprep.subr.bf16.mxu0 %v2699_v55 }
 0x239   :  { %2405 = vmatpush3.bf16.msra.mxu0 %v2540_v60  ;;  %v2556_v60 = vld [vmem:[#allocation7 + $0x38] sm:$0xff]  }
 0x23a   :  { %2406 = vmatprep.subr.bf16.mxu0 %v2699_v55  ;;  %2195 = vmatpush3.bf16.msra.mxu1 %v2556_v60 }
 0x23b   :  { %2420 = vmatprep.subr.bf16.mxu1 %v2699_v55 }
 0x23d   :  { %2407 = vmatpush3.bf16.msra.mxu0 %v2543_v63 }
 0x23e   :  { %2408 = vmatprep.subr.bf16.mxu0 %v2699_v55 }
 0x241   :  { %2409 = vmatpush3.bf16.msra.mxu0 %v2546_v2 }
 0x242   :  { %2410 = vmatprep.subr.bf16.mxu0 %v2699_v55 }
 0x245   :  { %2411 = vmatpush3.bf16.msra.mxu0 %v2549_v41 }
 0x246   :  { %2412 = vmatprep.subr.bf16.mxu0 %v2699_v55 }
 0x249   :  { %2413 = vmatpush3.bf16.msra.mxu0 %v2552_v50 }
 0x24a   :  { %2414 = vmatprep.subr.bf16.mxu0 %v2699_v55 }
 0x24d   :  { %2415 = vmatpush3.bf16.msra.mxu0 %v2555_v59 }
 0x2c3   :  { %v2318_v4 = vpop.f32.mrb[20].mxu0  ;;  %v2338_v5 = vpop.f32.mrb[20].mxu1 }
 0x2c4   :  { %v1024_v6 = vpop.f32.mrb[21].mxu0  ;;  %v1136_v7 = vpop.f32.mrb[21].mxu1  ;;  %v1533_v14 = vrot.slane %v2338_v5, 1 }
 0x2c5   :  { %v1490_v8 = vrot.slane %v1136_v7, 1  ;;  %v2319_v9 = vpop.f32.mrb[22].mxu0  ;;  %v2339_v10 = vpop.f32.mrb[22].mxu1 }
 0x2c6   :  { %v1027_v12 = vpop.f32.mrb[23].mxu0  ;;  %v1139_v13 = vpop.f32.mrb[23].mxu1 }
 0x2c7   :  { %v1492_v15 = vadd.f32 %v1490_v8, %v1024_v6  ;;  %v1532_v16 = vrot.slane %v1139_v13, 1 }
 0x2c9   :  { %v1534_v17 = vsel %vm239_vm2, %v1532_v16, %v1533_v14 }
 0x2ca   :  { %v1536_v18 = vadd.f32 %v1534_v17, %v1027_v12 }
 0x2e3   :  { %v2358_v21 = vpop.f32.mrb[24].mxu0  ;;  %v2378_v22 = vpop.f32.mrb[24].mxu1 }
 0x2e4   :  { %v1249_v11 = vpop.f32.mrb[25].mxu0  ;;  %v1362_v23 = vpop.f32.mrb[25].mxu1  ;;  %v1540_v26 = vrot.slane %v2358_v21, 2  ;;  %v1545_v27 = vrot.slane %v2378_v22, 3 }
 0x2e5   :  { %v1494_v24 = vrot.slane %v1249_v11, 2  ;;  %v2359_v20 = vpop.f32.mrb[26].mxu0  ;;  %v2379_v25 = vpop.f32.mrb[26].mxu1  ;;  %v1499_v32 = vrot.slane %v1362_v23, 3  ;;  %v2557_v11 = vld [vmem:[#allocation9] sm:$0xff]   ;;  %v2558_v23 = vld [vmem:[#allocation9 + $0x8] sm:$0xff]  }
 0x2e6   :  { %v1252_v29 = vpop.f32.mrb[27].mxu0  ;;  %v1365_v30 = vpop.f32.mrb[27].mxu1  ;;  %v2560_v20 = vld [vmem:[#allocation9 + $0x18] sm:$0xff]   ;;  %v2561_v25 = vld [vmem:[#allocation9 + $0x20] sm:$0xff]  }
 0x2e7   :  { %v1496_v31 = vadd.f32 %v1494_v24, %v1492_v15  ;;  %v1539_v33 = vrot.slane %v1252_v29, 2  ;;  %v1500_v34 = vrot.slane %v1365_v30, 3  ;;  %v2559_v24 = vld [vmem:[#allocation9 + $0x10] sm:$0xff]   ;;  %v2564_v29 = vld [vmem:[#allocation9 + $0x38] sm:$0xff]  }
 0x2e9   :  { %v1541_v35 = vsel %vm318_vm3, %v1539_v33, %v1540_v26  ;;  %v1501_v36 = vsel %vm397_vm4, %v1499_v32, %v1500_v34  ;;  %v1546_v37 = vsel %vm397_vm4, %v1500_v34, %v1545_v27  ;;  %v2562_v26 = vld [vmem:[#allocation9 + $0x28] sm:$0xff]   ;;  %v2563_v27 = vld [vmem:[#allocation9 + $0x30] sm:$0xff]  }
 0x2ea   :  { %v1543_v38 = vadd.f32 %v1541_v35, %v1536_v18  ;;  %v1503_v28 = vadd.f32 %v1501_v36, %v1496_v31  ;;  %v2056_v34 = vld [vmem:[%s2957_s5 + $0x2] ss:$0 sm:$0xff] }
 0x2ec   :  { %v1548_v19 = vadd.f32 %v1546_v37, %v1543_v38 }
 0x303   :  { %v2398_v39 = vpop.f32.mrb[28].mxu0 }
 0x304   :  { %v1475_v42 = vpop.f32.mrb[29].mxu0  ;;  %v1550_v46 = vrot.slane %v2398_v39, 4 }
 0x305   :  { %v2399_v44 = vpop.f32.mrb[30].mxu0  ;;  %v1506_v47 = vrot.slane %v1475_v42, 4 }
 0x306   :  { %v1478_v45 = vpop.f32.mrb[31].mxu0 }
 0x307   :  { %v1507_v48 = vrot.slane %v1478_v45, 4  ;;  %v2081_v45 = vld [vmem:[%s2957_s5 + $0x3] ss:$0 sm:$0xff] }
 0x309   :  { %v1508_v52 = vsel %vm120_vm0, %v1506_v47, %v1507_v48  ;;  %v1551_v53 = vsel %vm120_vm0, %v1507_v48, %v1550_v46 }
 0x30a   :  { %v1510_v56 = vadd.f32 %v1508_v52, %v1503_v28  ;;  %v1553_v57 = vadd.f32 %v1551_v53, %v1548_v19 }
 0x30c   :  { %v1515_v61 = vadd.f32 %v2053_v54, %v1510_v56  ;;  %v1554_v62 = vadd.f32 %v2053_v54, %v1553_v57 }
 0x30e   :  { %v2478_v63 = vpack.i.bf16 %v1554_v62, %v1515_v61 }
 0x310   :  { %2479 = vrot.lane.b32.xlu1 %v2478_v63, %s2701_s13 }
 0x382   :  { %v2480_v0 = vpop.permute.xlu1 %2479 }
 0x383   :  { %v2482_v1 = vunpack.i.h.bf16 %v2480_v0  ;;  %v2481_v2 = vunpack.i.l.bf16 %v2480_v0 }
 0x385   :  { %v1559_v3 = vmax.f32 %v1554_v62, %v2482_v1  ;;  %v1520_v4 = vmax.f32 %v1515_v61, %v2481_v2 }
 0x387   :  { %v1561_v5 = vrot.slane %v1559_v3, 1  ;;  %v1522_v6 = vrot.slane %v1520_v4, 1 }
 0x389   :  { %v1563_v7 = vmax.f32 %v1559_v3, %v1561_v5  ;;  %v1524_v8 = vmax.f32 %v1520_v4, %v1522_v6 }
 0x38b   :  { %v1567_v9 = vrot.slane %v1563_v7, 1  ;;  %v2055_v10 = vrot.slane %v1563_v7, 5  ;;  %v1528_v12 = vrot.slane %v1524_v8, 4  ;;  %v1526_v13 = vrot.slane %v1524_v8, 2 }
 0x38c   :  { %v2054_v14 = vrot.slane %v1563_v7, 3 }
 0x38d   :  { %v1575_v15 = vsel %vm540_vm5, %v1528_v12, %v2055_v10  ;;  %v1573_v16 = vsel %vm540_vm5, %v1524_v8, %v1567_v9 }
 0x38e   :  { %v1574_v17 = vsel %vm540_vm5, %v1526_v13, %v2054_v14  ;;  %v1578_v18 = vpack.c.bf16 %v1575_v15, %v1575_v15  ;;  %v1576_v21 = vpack.c.bf16 %v1573_v16, %v1573_v16 }
 0x38f   :  { %v1577_v22 = vpack.c.bf16 %v1574_v17, %v1574_v17 }
 0x390   :  { %2417 = vmatmul.mubr.bf16.vlgmr.msra.gmra.mrb[32].mxu0 %v1578_v18 }
 0x391   :  { %1807 = vmatprep.mubr.bf16.mxu1 %v1577_v22 }
 0x392   :  { %1808 = vmatmul.mubr.bf16.vlgmr.msra.gmra.mrb[28].mxu1 %v1576_v21 }
 0x393   :  { %2436 = vmatprep.mubr.msk.bf16.mxu1 %vm2700_vm8, %v2699_v55  ;;  %2421 = vmatpush3.bf16.msra.mxu1 %v2557_v11 }
 0x394   :  { %2422 = vmatprep.subr.bf16.mxu1 %v2699_v55 }
 0x397   :  { %2423 = vmatpush3.bf16.msra.mxu1 %v2558_v23 }
 0x398   :  { %2424 = vmatprep.subr.bf16.mxu1 %v2699_v55 }
 0x39b   :  { %2425 = vmatpush3.bf16.msra.mxu1 %v2559_v24 }
 0x39c   :  { %2426 = vmatprep.subr.bf16.mxu1 %v2699_v55 }
 0x39f   :  { %2427 = vmatpush3.bf16.msra.mxu1 %v2560_v20 }
 0x3a0   :  { %2428 = vmatprep.subr.bf16.mxu1 %v2699_v55 }
 0x3a3   :  { %2429 = vmatpush3.bf16.msra.mxu1 %v2561_v25 }
 0x3a4   :  { %2430 = vmatprep.subr.bf16.mxu1 %v2699_v55 }
 0x3a7   :  { %2431 = vmatpush3.bf16.msra.mxu1 %v2562_v26 }
 0x3a8   :  { %2432 = vmatprep.subr.bf16.mxu1 %v2699_v55 }
 0x3ab   :  { %2433 = vmatpush3.bf16.msra.mxu1 %v2563_v27 }
 0x3ac   :  { %2434 = vmatprep.subr.bf16.mxu1 %v2699_v55 }
 0x3af   :  { %2435 = vmatpush3.bf16.msra.mxu1 %v2564_v29 }
 0x463   :  { %v1849_v30 = vpop.f32.mrb[32].mxu0 }
 0x464   :  { %v2418_v31 = vpop.f32.mrb[33].mxu0 }
 0x465   :  { %v2196_v32 = vpop.f32.mrb[28].mxu1  ;;  %v1852_v33 = vpop.f32.mrb[34].mxu0 }
 0x466   :  { %v2197_v35 = vpop.f32.mrb[29].mxu1  ;;  %v2419_v36 = vpop.f32.mrb[35].mxu0 }
 0x467   :  { %v2198_v37 = vadd.f32 %v2197_v35, %v2196_v32  ;;  %v2199_v38 = vpop.f32.mrb[30].mxu1 }
 0x468   :  { %v2200_v28 = vpop.f32.mrb[31].mxu1 }
 0x469   :  { %v1810_v19 = vadd.f32 %v2198_v37, %v2056_v34 }
 0x46b   :  { %v1850_v39 = vadd.f32 %v1849_v30, %v1810_v19 }
 0x46d   :  { %v1855_v40 = vsub.f32 0.0, %v1850_v39 }
 0x46f   :  { %v1856_v41 = vmul.f32 1.442695, %v1855_v40 }
 0x471   :  { %2565 = vpow2.f32 %v1856_v41 }
 0x47b   :  { %v2566_v55 = vpop.eup %2565 }
 0x47c   :  { %v1858_v42 = vadd.f32 1.0, %v2566_v55 }
 0x47e   :  { %2567 = vrcp.f32 %v1858_v42 }
 0x488   :  { %v2568_v43 = vpop.eup %2567 }
 0x489   :  { %v1860_v44 = vpack.c.bf16 %v2568_v43, %v2568_v43 }
 0x48b   :  { %2437 = vmatmul.mubr.bf16.vlgmr.msra.gmra.mrb[32].mxu1 %v1860_v44 }
 0x55e   :  { %v1963_v46 = vpop.f32.mrb[32].mxu1 }
 0x55f   :  { %v1964_v47 = vadd.f32 %v2081_v45, %v1963_v46  ;;  %v2438_v48 = vpop.f32.mrb[33].mxu1 }
 0x560   :  { %v1966_v49 = vpop.f32.mrb[34].mxu1 }
 0x561   :  { %v1969_v50 = vsub.f32 0.0, %v1964_v47  ;;  %v2439_v51 = vpop.f32.mrb[35].mxu1 }
 0x563   :  { %v1970_v52 = vmul.f32 1.442695, %v1969_v50 }
 0x565   :  { %2569 = vpow2.f32 %v1970_v52 }
 0x56f   :  { %v2570_v53 = vpop.eup %2569 }
 0x570   :  { %v1972_v54 = vadd.f32 1.0, %v2570_v53 }
 0x572   :  { %2571 = vrcp.f32 %v1972_v54 }
 0x57c   :  { %v2572_v56 = vpop.eup %2571 }
 0x57d   :  { %1974 = vst [vmem:[%s2958_s6] sm:$0x3] %v2572_v56 }
 0x57e   :  { %1979 = vsyncpa [#allocation3], 1 }
 0x57f   :  { %1980 = vsyncpa [#allocation5], 1 }
 0x580   :  { %1981 = vsyncpa [#allocation8], 1 }

</bundles_post_ra>
